<compile_context>
chip_gen: v7x
topology: tpu7x:2x2x1
jax: 0.10.0
libtpu: 0.0.40
codegen_flags: <defaults>
</compile_context>

<pallas_src>
import functools

import jax
import jax.numpy as jnp
from jax.experimental import pallas as pl
from jax.experimental.pallas import tpu as pltpu


def _round_up(v, m):
    return (v + m - 1) // m * m


def _auto_tile_nodes(n, f, b_pad, w_total, budget_bytes=24 << 20):
    """Largest node tile (multiple of 128, capped at 8192) whose rough VMEM footprint fits."""
    n_cap = min(_round_up(max(n, 1), 128), 8192)
    fixed = (2 * f * w_total * 2          # double-buffered resident bf16 weight
             + 2 * w_total * 4            # double-buffered f32 bias
             + b_pad * w_total * 4        # fused accumulator scratch
             + b_pad * 4                  # running-max scratch
             + 2 * b_pad * w_total * 4)   # output block
    per_node = (2 * f * 2                 # double-buffered bf16 x tile
                + 6 * w_total             # projected slab hg (f32) + its bf16 copy
                + 14 * b_pad)             # mask / masked gate / e_bt (f32 + bf16)
    avail = max(budget_bytes - fixed, per_node * 128)
    return max(128, min(n_cap, (avail // per_node) // 128 * 128))


def global_attention_kernel(brow_ref, x_ref, w_ref, b_ref, out_ref, gmax_ref, acc_ref):
    k = pl.program_id(0)
    b_pad, f_out_pad = out_ref.shape
    tn = x_ref.shape[0]
    gate_col = f_out_pad          # first lane of the extra 128-lane block
    ones_col = f_out_pad + 1      # constant-one column -> softmax denominator
    neg_big = jnp.float32(-1e30)

    @pl.when(k == 0)
    def _():
        gmax_ref[...] = jnp.full_like(gmax_ref, neg_big)
        acc_ref[...] = jnp.zeros_like(acc_ref)

    # Fused projection, bf16 MXU / f32 accumulate: columns = [h | gate | 1 | 0...].
    hg = jnp.dot(x_ref[...], w_ref[...],
                 preferred_element_type=jnp.float32) + b_ref[...]          # [TN, Fp+128] f32
    gate_row = hg[:, gate_col:gate_col + 1].reshape(1, tn)                 # [1, TN] (one relayout/tile)

    # Graph-membership mask straight from an iota compare (padded nodes carry id -1).
    row_ids = jax.lax.broadcasted_iota(jnp.int32, (b_pad, tn), 0)
    mask = brow_ref[...] == row_ids                                        # [B, TN] bool

    # Online segment-softmax running max.
    tile_max = jnp.max(jnp.where(mask, gate_row, neg_big), axis=1, keepdims=True)  # [B, 1]
    old_max = gmax_ref[...]
    new_max = jnp.maximum(old_max, tile_max)

    @pl.when(jnp.max((new_max > old_max).astype(jnp.float32)) > 0.0)
    def _():
        # Rescale the whole fused accumulator only when some running max actually moved.
        acc_ref[...] = acc_ref[...] * jnp.exp(old_max - new_max)
        gmax_ref[...] = new_max

    # e in [B, TN] orientation; one pooling matmul yields (sum e*h | sum e*gate | sum e).
    e_bt = jnp.exp(jnp.where(mask, gate_row - new_max, neg_big))           # [B, TN] f32
    acc_ref[...] += jnp.dot(e_bt.astype(jnp.bfloat16), hg.astype(jnp.bfloat16),
                            preferred_element_type=jnp.float32)            # [B, Fp+128]

    @pl.when(k == pl.num_programs(0) - 1)
    def _():
        gsum = acc_ref[:, ones_col:ones_col + 1]                           # [B, 1]
        out_ref[...] = acc_ref[:, :f_out_pad] / (gsum + jnp.float32(1e-16))


@functools.partial(jax.jit, static_argnames=("num_graphs", "tile_nodes"))
def global_attention(x, batch, wg, bg, wn, bn, num_graphs, tile_nodes=None):
    n, f = x.shape
    f_out = wn.shape[1]

    f_out_pad = _round_up(f_out, 128)
    w_total = f_out_pad + 128            # extra lane block carries [gate | ones | 0...]
    gate_col, ones_col = f_out_pad, f_out_pad + 1
    b_pad = _round_up(num_graphs, 8)

    if tile_nodes is None:
        tn = _auto_tile_nodes(n, f, b_pad, w_total)
    else:
        tn = _round_up(min(tile_nodes, _round_up(n, 128)), 128)
    n_pad = _round_up(n, tn)
    num_tiles = n_pad // tn

    # Fused weight / bias. Built in f32, cast once to bf16 (ones / zeros are exact in bf16).
    w_fused = jnp.zeros((f, w_total), jnp.float32)
    w_fused = w_fused.at[:, :f_out].set(wn.astype(jnp.float32))
    w_fused = w_fused.at[:, gate_col:gate_col + 1].set(wg.astype(jnp.float32))
    w_fused = w_fused.astype(jnp.bfloat16)
    b_fused = jnp.zeros((1, w_total), jnp.float32)
    b_fused = b_fused.at[:, :f_out].set(bn.reshape(1, f_out).astype(jnp.float32))
    b_fused = b_fused.at[:, gate_col].set(bg.reshape(()).astype(jnp.float32))
    b_fused = b_fused.at[:, ones_col].set(1.0)

    # bf16 node features; cast + (tail-only) pad fuse into a single pass. Padded nodes get id -1.
    x_bf = x.astype(jnp.bfloat16)
    if n_pad != n:
        x_bf = jnp.pad(x_bf, ((0, n_pad - n), (0, 0)))
    batch_row = jnp.full((1, n_pad), -1, jnp.int32).at[0, :n].set(batch.astype(jnp.int32))

    out = pl.pallas_call(
        global_attention_kernel,
        out_shape=jax.ShapeDtypeStruct((b_pad, f_out_pad), jnp.float32),
        grid_spec=pltpu.PrefetchScalarGridSpec(
            num_scalar_prefetch=0,
            grid=(num_tiles,),
            in_specs=[
                pl.BlockSpec((1, tn), lambda k: (0, k)),        # batch ids (row form)
                pl.BlockSpec((tn, f), lambda k: (k, 0)),        # x tile (streamed, bf16)
                pl.BlockSpec((f, w_total), lambda k: (0, 0)),   # fused weight (resident)
                pl.BlockSpec((1, w_total), lambda k: (0, 0)),   # fused bias (resident)
            ],
            out_specs=pl.BlockSpec((b_pad, f_out_pad), lambda k: (0, 0)),
            scratch_shapes=[
                pltpu.VMEM((b_pad, 1), jnp.float32),            # running per-graph max
                pltpu.VMEM((b_pad, w_total), jnp.float32),      # fused accumulator
            ],
        ),
        compiler_params=pltpu.CompilerParams(
            dimension_semantics=("arbitrary",),
            vmem_limit_bytes=32 * 1024 * 1024),
    )(batch_row, x_bf, w_fused, b_fused)

    return out[:num_graphs, :f_out]


def reference(x, batch, wg, bg, wn, bn, num_graphs):
    """Pure-JAX (f32) reference mirroring the PyTorch forward."""
    gate = x @ wg + bg                               # [N, 1]
    h = x @ wn + bn                                  # [N, F_out]
    group_max = jax.ops.segment_max(gate, batch, num_segments=num_graphs)
    e = jnp.exp(gate - group_max[batch])
    group_sum = jax.ops.segment_sum(e, batch, num_segments=num_graphs)
    w = e / (group_sum[batch] + 1e-16)
    return jax.ops.segment_sum(w * h, batch, num_segments=num_graphs)


if __name__ == "__main__":
    key = jax.random.PRNGKey(0)
    k_x, k_b, k_wg, k_bg, k_wn, k_bn = jax.random.split(key, 6)

    # nodes, in_channels, out_channels, graphs — chosen so the kernel runs >1 node tile.
    N, F, F_OUT, B = 200, 32, 48, 6
    TILE = 128                                   # -> n_pad = 256, grid = (2,)

    x = jax.random.normal(k_x, (N, F), dtype=jnp.float32)
    batch = jax.random.randint(k_b, (N,), 0, B).astype(jnp.int32)

    wg = jax.random.normal(k_wg, (F, 1), dtype=jnp.float32) * 0.1
    bg = jax.random.normal(k_bg, (1, 1), dtype=jnp.float32) * 0.1
    wn = jax.random.normal(k_wn, (F, F_OUT), dtype=jnp.float32) * 0.1
    bn = jax.random.normal(k_bn, (1, F_OUT), dtype=jnp.float32) * 0.1

    out = jax.block_until_ready(global_attention(x, batch, wg, bg, wn, bn, B, tile_nodes=TILE))
    ref = reference(x, batch, wg, bg, wn, bn, B)

    assert out.shape == (B, F_OUT), out.shape
    # bf16 MXU inputs (f32 accumulation) -> relaxed tolerance vs the f32 reference.
    assert jnp.allclose(out, ref, atol=2e-2, rtol=2e-2), (out, ref)

    print("KERNEL_OK")
</pallas_src>

<mosaic_0001>
module attributes {stable_mosaic.version = 11 : i64} {
  func.func @global_attention_kernel(%arg0: i32, %arg1: memref<1x128xi32, #tpu.memory_space<vmem>>, %arg2: memref<128x32xbf16, #tpu.memory_space<vmem>>, %arg3: memref<32x256xbf16, #tpu.memory_space<vmem>>, %arg4: memref<1x256xf32, #tpu.memory_space<vmem>>, %arg5: memref<8x128xf32, #tpu.memory_space<vmem>>, %arg6: memref<8x1xf32, #tpu.memory_space<vmem>>, %arg7: memref<8x256xf32, #tpu.memory_space<vmem>>) attributes {dimension_semantics = [#tpu.dimension_semantics<arbitrary>], iteration_bounds = array<i64: 2>, scalar_prefetch = 0 : i64, scratch_operands = 2 : i64, tpu.core_type = #tpu.core_type<tc>, window_params = [{transform_indices = @transform_0, window_bounds = array<i64: 1, 128>}, {transform_indices = @transform_1, window_bounds = array<i64: 128, 32>}, {pipeline_mode = #tpu.pipeline_mode<synchronous>, transform_indices = @transform_2, window_bounds = array<i64: 32, 256>}, {pipeline_mode = #tpu.pipeline_mode<synchronous>, transform_indices = @transform_3, window_bounds = array<i64: 1, 256>}, {pipeline_mode = #tpu.pipeline_mode<synchronous>, transform_indices = @transform_4, window_bounds = array<i64: 8, 128>}]} {
    %c0_i32 = arith.constant 0 : i32
    %0 = arith.cmpi eq, %arg0, %c0_i32 : i32
    %1 = arith.extui %0 : i1 to i32
    %cst = arith.constant -1.000000e+30 : f32
    %c0_i32_0 = arith.constant 0 : i32
    %2 = arith.cmpi ne, %1, %c0_i32_0 : i32
    scf.if %2 {
      %48 = vector.broadcast %cst : f32 to vector<8x1xf32>
      %c0_23 = arith.constant 0 : index
      %c0_24 = arith.constant 0 : index
      %49 = vector.load %arg6[%c0_23, %c0_24] : memref<8x1xf32, #tpu.memory_space<vmem>>, vector<8x1xf32>
      tpu.vector_store %arg6[%c0_23, %c0_24], %48 {strides = array<i32>} : memref<8x1xf32, #tpu.memory_space<vmem>>, vector<8x1xf32>,
      %cst_25 = arith.constant 0.000000e+00 : f32
      %50 = vector.broadcast %cst_25 : f32 to vector<8x256xf32>
      %c0_26 = arith.constant 0 : index
      %c0_27 = arith.constant 0 : index
      %51 = vector.load %arg7[%c0_26, %c0_27] : memref<8x256xf32, #tpu.memory_space<vmem>>, vector<8x256xf32>
      tpu.vector_store %arg7[%c0_26, %c0_27], %50 {strides = array<i32>} : memref<8x256xf32, #tpu.memory_space<vmem>>, vector<8x256xf32>,
    } else {
    }
    %c0 = arith.constant 0 : index
    %c0_1 = arith.constant 0 : index
    %3 = vector.load %arg2[%c0, %c0_1] : memref<128x32xbf16, #tpu.memory_space<vmem>>, vector<128x32xbf16>
    %c0_2 = arith.constant 0 : index
    %c0_3 = arith.constant 0 : index
    %4 = vector.load %arg3[%c0_2, %c0_3] : memref<32x256xbf16, #tpu.memory_space<vmem>>, vector<32x256xbf16>
    %cst_4 = arith.constant dense<0.000000e+00> : vector<128x256xf32>
    %5 = tpu.matmul %3, %4, %cst_4 {dimension_numbers = #tpu.dot_dimension_numbers<[1], [0], [0], [1], [0, 0, 1, 1], [], []>} : vector<128x32xbf16>, vector<32x256xbf16>, vector<128x256xf32> -> vector<128x256xf32>
    %c0_5 = arith.constant 0 : index
    %c0_6 = arith.constant 0 : index
    %6 = vector.load %arg4[%c0_5, %c0_6] : memref<1x256xf32, #tpu.memory_space<vmem>>, vector<1x256xf32>
    %7 = vector.broadcast %6 : vector<1x256xf32> to vector<128x256xf32>
    %8 = arith.addf %5, %7 : vector<128x256xf32>
    %9 = vector.extract_strided_slice %8 {offsets = [0, 128], sizes = [128, 1], strides = [1, 1]} : vector<128x256xf32> to vector<128x1xf32>
    %10 = vector.shape_cast %9 : vector<128x1xf32> to vector<1x128xf32>
    %11 = tpu.iota {dimensions = array<i32: 0>} : vector<8x128xi32>
    %c0_7 = arith.constant 0 : index
    %c0_8 = arith.constant 0 : index
    %12 = vector.load %arg1[%c0_7, %c0_8] : memref<1x128xi32, #tpu.memory_space<vmem>>, vector<1x128xi32>
    %13 = vector.broadcast %12 : vector<1x128xi32> to vector<8x128xi32>
    %14 = arith.cmpi eq, %13, %11 : vector<8x128xi32>
    %cst_9 = arith.constant -1.000000e+30 : f32
    %15 = vector.shape_cast %10 : vector<1x128xf32> to vector<1x128xf32>
    %16 = vector.broadcast %15 : vector<1x128xf32> to vector<8x128xf32>
    %17 = vector.broadcast %cst_9 : f32 to vector<8x128xf32>
    %18 = arith.select %14, %16, %17 : vector<8x128xi1>, vector<8x128xf32>
    %cst_10 = arith.constant dense<0xFF800000> : vector<8xf32>
    %19 = vector.multi_reduction <maximumf>, %18, %cst_10 [1] : vector<8x128xf32> to vector<8xf32>
    %20 = vector.shape_cast %19 : vector<8xf32> to vector<8x1xf32>
    %c0_11 = arith.constant 0 : index
    %c0_12 = arith.constant 0 : index
    %21 = vector.load %arg6[%c0_11, %c0_12] : memref<8x1xf32, #tpu.memory_space<vmem>>, vector<8x1xf32>
    %22 = arith.maximumf %21, %20 : vector<8x1xf32>
    %23 = arith.cmpf ogt, %22, %21 : vector<8x1xf32>
    %24 = arith.extui %23 : vector<8x1xi1> to vector<8x1xi32>
    %25 = arith.sitofp %24 : vector<8x1xi32> to vector<8x1xf32>
    %26 = vector.shape_cast %25 : vector<8x1xf32> to vector<1x8x1xf32>
    %cst_13 = arith.constant dense<0xFF800000> : vector<1xf32>
    %27 = vector.multi_reduction <maximumf>, %26, %cst_13 [1, 2] : vector<1x8x1xf32> to vector<1xf32>
    %28 = vector.shape_cast %27 : vector<1xf32> to vector<1x1x1xf32>
    %29 = vector.extract %28[0, 0, 0] : f32 from vector<1x1x1xf32>
    %cst_14 = arith.constant 0.000000e+00 : f32
    %30 = arith.cmpf ogt, %29, %cst_14 : f32
    %31 = arith.extui %30 : i1 to i32
    %c0_i32_15 = arith.constant 0 : i32
    %32 = arith.cmpi ne, %31, %c0_i32_15 : i32
    scf.if %32 {
      %c0_23 = arith.constant 0 : index
      %c0_24 = arith.constant 0 : index
      %48 = vector.load %arg7[%c0_23, %c0_24] : memref<8x256xf32, #tpu.memory_space<vmem>>, vector<8x256xf32>
      %49 = arith.subf %21, %22 : vector<8x1xf32>
      %50 = math.exp %49 : vector<8x1xf32>
      %51 = vector.broadcast %50 : vector<8x1xf32> to vector<8x256xf32>
      %52 = arith.mulf %48, %51 : vector<8x256xf32>
      %c0_25 = arith.constant 0 : index
      %c0_26 = arith.constant 0 : index
      %53 = vector.load %arg7[%c0_25, %c0_26] : memref<8x256xf32, #tpu.memory_space<vmem>>, vector<8x256xf32>
      tpu.vector_store %arg7[%c0_25, %c0_26], %52 {strides = array<i32>} : memref<8x256xf32, #tpu.memory_space<vmem>>, vector<8x256xf32>,
      %c0_27 = arith.constant 0 : index
      %c0_28 = arith.constant 0 : index
      %54 = vector.load %arg6[%c0_27, %c0_28] : memref<8x1xf32, #tpu.memory_space<vmem>>, vector<8x1xf32>
      tpu.vector_store %arg6[%c0_27, %c0_28], %22 {strides = array<i32>} : memref<8x1xf32, #tpu.memory_space<vmem>>, vector<8x1xf32>,
    } else {
    }
    %33 = vector.broadcast %10 : vector<1x128xf32> to vector<8x128xf32>
    %34 = vector.broadcast %22 : vector<8x1xf32> to vector<8x128xf32>
    %35 = arith.subf %33, %34 : vector<8x128xf32>
    %cst_16 = arith.constant -1.000000e+30 : f32
    %36 = vector.broadcast %cst_16 : f32 to vector<8x128xf32>
    %37 = arith.select %14, %35, %36 : vector<8x128xi1>, vector<8x128xf32>
    %38 = math.exp %37 : vector<8x128xf32>
    %c0_17 = arith.constant 0 : index
    %c0_18 = arith.constant 0 : index
    %39 = vector.load %arg7[%c0_17, %c0_18] : memref<8x256xf32, #tpu.memory_space<vmem>>, vector<8x256xf32>
    %40 = arith.truncf %38 : vector<8x128xf32> to vector<8x128xbf16>
    %41 = arith.truncf %8 : vector<128x256xf32> to vector<128x256xbf16>
    %cst_19 = arith.constant dense<0.000000e+00> : vector<8x256xf32>
    %42 = tpu.matmul %40, %41, %cst_19 {dimension_numbers = #tpu.dot_dimension_numbers<[1], [0], [0], [1], [0, 0, 1, 1], [], []>} : vector<8x128xbf16>, vector<128x256xbf16>, vector<8x256xf32> -> vector<8x256xf32>
    %43 = arith.addf %39, %42 : vector<8x256xf32>
    %c0_20 = arith.constant 0 : index
    %c0_21 = arith.constant 0 : index
    %44 = vector.load %arg7[%c0_20, %c0_21] : memref<8x256xf32, #tpu.memory_space<vmem>>, vector<8x256xf32>
    tpu.vector_store %arg7[%c0_20, %c0_21], %43 {strides = array<i32>} : memref<8x256xf32, #tpu.memory_space<vmem>>, vector<8x256xf32>,
    %c1_i32 = arith.constant 1 : i32
    %45 = arith.cmpi eq, %arg0, %c1_i32 : i32
    %46 = arith.extui %45 : i1 to i32
    %c0_i32_22 = arith.constant 0 : i32
    %47 = arith.cmpi ne, %46, %c0_i32_22 : i32
    scf.if %47 {
      %c0_23 = arith.constant 0 : index
      %c129 = arith.constant 129 : index
      %48 = vector.load %arg7[%c0_23, %c129] : memref<8x256xf32, #tpu.memory_space<vmem>>, vector<8x1xf32>
      %c0_24 = arith.constant 0 : index
      %c0_25 = arith.constant 0 : index
      %49 = vector.load %arg7[%c0_24, %c0_25] : memref<8x256xf32, #tpu.memory_space<vmem>>, vector<8x128xf32>
      %cst_26 = arith.constant 1.000000e-16 : f32
      %50 = vector.broadcast %cst_26 : f32 to vector<8x1xf32>
      %51 = arith.addf %48, %50 : vector<8x1xf32>
      %52 = vector.broadcast %51 : vector<8x1xf32> to vector<8x128xf32>
      %53 = arith.divf %49, %52 : vector<8x128xf32>
      %c0_27 = arith.constant 0 : index
      %c0_28 = arith.constant 0 : index
      %54 = vector.load %arg5[%c0_27, %c0_28] : memref<8x128xf32, #tpu.memory_space<vmem>>, vector<8x128xf32>
      tpu.vector_store %arg5[%c0_27, %c0_28], %53 {strides = array<i32>} : memref<8x128xf32, #tpu.memory_space<vmem>>, vector<8x128xf32>,
    } else {
    }
    return
  }
  func.func @transform_0(%arg0: i32) -> (i32, i32) {
    %c0_i32 = arith.constant 0 : i32
    %c0_i32_0 = arith.constant 0 : i32
    return %c0_i32, %arg0 : i32, i32
  }
  func.func @transform_1(%arg0: i32) -> (i32, i32) {
    %c0_i32 = arith.constant 0 : i32
    %c0_i32_0 = arith.constant 0 : i32
    return %arg0, %c0_i32 : i32, i32
  }
  func.func @transform_2(%arg0: i32) -> (i32, i32) {
    %c0_i32 = arith.constant 0 : i32
    %c0_i32_0 = arith.constant 0 : i32
    %c0_i32_1 = arith.constant 0 : i32
    return %c0_i32, %c0_i32_0 : i32, i32
  }
  func.func @transform_3(%arg0: i32) -> (i32, i32) {
    %c0_i32 = arith.constant 0 : i32
    %c0_i32_0 = arith.constant 0 : i32
    %c0_i32_1 = arith.constant 0 : i32
    return %c0_i32, %c0_i32_0 : i32, i32
  }
  func.func @transform_4(%arg0: i32) -> (i32, i32) {
    %c0_i32 = arith.constant 0 : i32
    %c0_i32_0 = arith.constant 0 : i32
    %c0_i32_1 = arith.constant 0 : i32
    return %c0_i32, %c0_i32_0 : i32, i32
  }
}

</mosaic_0001>

<bundles_post_ra>
// kernel: global_attention.1
= control target key start
LH: loop header
LB: loop body
LE: loop exit
PB: predicated region body
PF: predicated region fallthrough
CT: control target
= control target key end

     0   :  { %9 = vsyncpa [#allocation5], 0  ;;  %s2288_s15 = smov 0   ;;  %s3245_s0 = inlined_call_operand.vmem [shape: s32[1,256], index: 0, kind: input, shape index: {}]   ;;  %s3246_s1 = inlined_call_operand.vmem [shape: bf16[256,32], index: 1, kind: input, shape index: {}]   ;;  %s3247_s2 = inlined_call_operand.vmem [shape: bf16[32,256], index: 2, kind: input, shape index: {}]   ;;  %s3248_s3 = inlined_call_operand.vmem [shape: f32[1,256], index: 3, kind: input, shape index: {}]   ;;  %s3249_s4 = inlined_call_operand.hbm [shape: f32[8,128], index: 4, kind: output, shape index: {}]  }
   0x1 LB: > { %s2294_s16 = sadd.s32 4294967295, %s2254_s15   ;;  %p2138_p0 = scmp.ge.s32.totalorder %s2254_s15, 1  ;;  %s2254_s15 = sphi %s2288_s15, %s15_s15  }
   0x2   : > { %p167_p1 = scmp.lt.s32.totalorder %s2254_s15, 3 }
   0x4   : > { %p168_p2 = pnand %p2138_p0, %p167_p1 }
   0x6   : > { %171 = sbr.rel (%p168_p2) target bundleno = 1863 (0x747), region = 36 }
   0xd   : > { %p191_p3 = scmp.lt.s32.totalorder %s2294_s16, 1  ;;  %s2139_s17 = sshll.u32 %s2294_s16, 4 }
   0xe   : > { %p195_p4 = scmp.lt.s32.totalorder %s2139_s17, 31  ;;  %p2141_p5 = scmp.ne.s32.totalorder %s2294_s16, 0 }
   0xf   : > { %s2301_s18 = scalar_select %p191_p3, %s2294_s16, 1 }
  0x10   : > { %s3390_s17 = smov (!%p195_p4, %s2139_s17), 31  ;;  %204 = sbr.rel (%p2141_p5) target bundleno = 23 (0x17), region = 40 }
  0x11   : > { %s193_s21 = scalar_lea.vmem %s3245_s0, %s2301_s18  ;;  %s2140_s22 = sshll.u32 %s3390_s17, 2  ;;  %vm205_vm0 = vcmask (!%p2141_p5), 7168   ;;  %v2256_v0 = vmov (!%p2141_p5), -1e+30   ;;  %v2257_v1 = vmov (!%p2141_p5), 0.0  }
  0x12   : > { %s2310_s25 = scalar_lea.vmem %s3246_s1, %s2140_s22  ;;  %206 = vst.msk [vmem:[#allocation2] sm:$0xff] (!%p2141_p5), %vm205_vm0, %v2256_v0  ;;  %207 = vst [vmem:[#allocation3] sm:$0xff] (!%p2141_p5), %v2257_v1 }
  0x13   : > { %208 = vst [vmem:[#allocation3 + $0x8] sm:$0xff] (!%p2141_p5), %v2257_v1 }
  0x17 PF: > { %v2194_v2 = vld [vmem:[%s3247_s2 + $0x4] ss:$8 sps:$4 sm:$0xff]   ;;  %v2196_v3 = vld [vmem:[%s3247_s2] ss:$8 sps:$4 sm:$0xff]   ;;  %v3261_v4 = vmov 0   ;;  %vm301_vm1 = vcmask 261120   ;;  %v231_v15 = vlaneseq }
  0x18   : > { %358 = vmatprep.mubr.bf16.mxu0 %v3261_v4  ;;  %2192 = vset.pattern.permute.xlu0 %v3261_v4  ;;  %v2197_v5 = vld [vmem:[%s3247_s2 + $0x14] ss:$8 sps:$4 sm:$0xff]   ;;  %v2199_v6 = vld [vmem:[%s3247_s2 + $0x10] ss:$8 sps:$4 sm:$0xff]   ;;  %v2200_v7 = vld [vmem:[%s2310_s25] sm:$0xff]   ;;  %vm522_vm2 = vcmask 130112  }
  0x19   : > { %326 = vmatprep.subr.bf16.mxu0 %v2194_v2  ;;  %2193 = vset.pattern.permute.xlu1 %v3261_v4  ;;  %v2201_v8 = vld [vmem:[%s2310_s25 + $0x8] sm:$0xff]   ;;  %v2202_v9 = vld [vmem:[%s2310_s25 + $0x10] sm:$0xff]   ;;  %v2203_v10 = vld [vmem:[%s2310_s25 + $0x18] sm:$0xff]   ;;  %v2352_v16 = vshrl.u32 %v231_v15, 7  ;;  %vm529_vm3 = vcmask 195712   ;;  %vm536_vm4 = vcmask 261312  }
  0x1a   : > { %327 = vmatpush1.bf16.msra.mxu0 %v2196_v3  ;;  %v2204_v11 = vld [vmem:[%s2310_s25 + $0x20] sm:$0xff]   ;;  %v2205_v12 = vld [vmem:[%s2310_s25 + $0x28] sm:$0xff]   ;;  %v2206_v13 = vld [vmem:[%s2310_s25 + $0x30] sm:$0xff]   ;;  %vm543_vm5 = vcmask 326912   ;;  %vm550_vm6 = vcmask 392512   ;;  %vm557_vm7 = vcmask 458112  }
  0x1b   : > { %328 = vmatprep.subr.bf16.mxu0 %v2197_v5  ;;  %v2207_v14 = vld [vmem:[%s2310_s25 + $0x38] sm:$0xff]   ;;  %3270 = vst [vmem:[#allocation7_spill] sm:$0xff] %v2352_v16  ;;  %v3260_v17 = vsub.s32 0, %v2352_v16  ;;  %v229_v18 = vld [vmem:[%s3248_s3] sm:$0x3]  ;;  %v3250_v19 = vsub.s32 1, %v2352_v16 }
  0x1c   : > { %vm3259_vm8 = vcmask 523712   ;;  %vm3258_vm9 = vcmask 589312   ;;  %vm3256_vm10 = vcmask 654912   ;;  %vm3254_vm11 = vcmask 720512  }
  0x1d   : > { %v2361_v20 = vrot.slane %v229_v18, %v3260_v17  ;;  %v2365_v21 = vrot.slane %v229_v18, %v3250_v19  ;;  %vm3253_vm12 = vcmask 786112   ;;  %vm3252_vm13 = vcmask 851712  }
  0x1e   : > { %329 = vmatpush1.bf16.msra.mxu0 %v2199_v6  ;;  %vm3251_vm14 = vcmask 917312   ;;  %vm3255_vm15 = vcmask 982912   ;;  %vm3257_vm0 = vcmask 1048512  }
  0x21   : > { %2154 = vmatmul.mubr.msk.bf16.vlgmr.msra.gmra.mrb[0].mxu0 %vm301_vm1, %v2200_v7 }
  0x22   : > { %368 = vmatprep.mubr.bf16.mxu0 %v3261_v4 }
  0x29   : > { %2155 = vmatmul.mubr.msk.bf16.gmra.mrb[4].mxu0 %vm301_vm1, %v2201_v8 }
  0x2a   : > { %378 = vmatprep.mubr.bf16.mxu0 %v3261_v4 }
  0x31   : > { %2156 = vmatmul.mubr.msk.bf16.gmra.mrb[8].mxu0 %vm301_vm1, %v2202_v9 }
  0x32   : > { %388 = vmatprep.mubr.bf16.mxu0 %v3261_v4 }
  0x39   : > { %2157 = vmatmul.mubr.msk.bf16.gmra.mrb[12].mxu0 %vm301_vm1, %v2203_v10 }
  0x3a   : > { %398 = vmatprep.mubr.bf16.mxu0 %v3261_v4 }
  0x41   : > { %2158 = vmatmul.mubr.msk.bf16.gmra.mrb[16].mxu0 %vm301_vm1, %v2204_v11 }
  0x42   : > { %408 = vmatprep.mubr.bf16.mxu0 %v3261_v4 }
  0x49   : > { %2159 = vmatmul.mubr.msk.bf16.gmra.mrb[20].mxu0 %vm301_vm1, %v2205_v12 }
  0x4a   : > { %418 = vmatprep.mubr.bf16.mxu0 %v3261_v4 }
  0x51   : > { %2160 = vmatmul.mubr.msk.bf16.gmra.mrb[24].mxu0 %vm301_vm1, %v2206_v13 }
  0x52   : > { %428 = vmatprep.mubr.bf16.mxu0 %v3261_v4 }
  0x59   : > { %2161 = vmatmul.mubr.msk.bf16.gmra.mrb[28].mxu0 %vm301_vm1, %v2207_v14 }
  0xf4   : > { %v360_v22 = vpop.f32.mrb[0].mxu0 }
  0xf5   : > { %v2368_v23 = vadd.f32 %v360_v22, %v2361_v20  ;;  %v362_v24 = vpop.f32.mrb[1].mxu0 }
  0xf6   : > { %v2371_v25 = vadd.f32 %v362_v24, %v2365_v21  ;;  %v364_v26 = vpop.f32.mrb[2].mxu0 }
  0xf7   : > { %3271 = vst [vmem:[#allocation8_spill] sm:$0xff] %v2368_v23  ;;  %v2374_v27 = vadd.f32 %v364_v26, %v2361_v20  ;;  %v366_v28 = vpop.f32.mrb[3].mxu0 }
  0xf8   : > { %464 = vperm.xlu0 %2192, %v2371_v25   ;;  %v2378_v29 = vadd.f32 %v366_v28, %v2365_v21 }
  0xf9   : > { %3272 = vst [vmem:[#allocation9_spill] sm:$0xff] %v2374_v27 }
  0xfa   : > { %3273 = vst [vmem:[#allocation10_spill] sm:$0xff] %v2378_v29 }
  0xfc   : > { %v370_v30 = vpop.f32.mrb[4].mxu0  ;;  %467 = vperm.xlu0 %2192, %v2378_v29  }
  0xfd   : > { %v2382_v31 = vadd.f32 %v370_v30, %v2361_v20  ;;  %v372_v32 = vpop.f32.mrb[5].mxu0 }
  0xfe   : > { %v2385_v33 = vadd.f32 %v372_v32, %v2365_v21  ;;  %v374_v34 = vpop.f32.mrb[6].mxu0 }
  0xff   : > { %3274 = vst [vmem:[#allocation11_spill] sm:$0xff] %v2382_v31  ;;  %v2388_v35 = vadd.f32 %v374_v34, %v2361_v20  ;;  %v376_v36 = vpop.f32.mrb[7].mxu0 }
 0x100   : > { %3275 = vst [vmem:[#allocation12_spill] sm:$0xff] %v2385_v33  ;;  %470 = vperm.xlu1 %2193, %v2385_v33   ;;  %v2392_v37 = vadd.f32 %v376_v36, %v2365_v21  ;;  %v2480_v36 = vand.u32 127, %v231_v15 }
 0x101   : > { %3276 = vst [vmem:[#allocation13_spill] sm:$0xff] %v2388_v35 }
 0x102   : > { %3277 = vst [vmem:[#allocation14_spill] sm:$0xff] %v2392_v37  ;;  %v2494_v15 = vsub.s32 %v2480_v36, %v2352_v16 }
 0x104   : > { %v380_v38 = vpop.f32.mrb[8].mxu0  ;;  %473 = vperm.xlu1 %2193, %v2392_v37  }
 0x105   : > { %v2396_v39 = vadd.f32 %v380_v38, %v2361_v20  ;;  %v382_v40 = vpop.f32.mrb[9].mxu0 }
 0x106   : > { %v2399_v41 = vadd.f32 %v382_v40, %v2365_v21  ;;  %v384_v42 = vpop.f32.mrb[10].mxu0  ;;  %v517_v40 = vadd.s32 4294967288, %v2480_v36 }
 0x107   : > { %3278 = vst [vmem:[#allocation15_spill] sm:$0xff] %v2396_v39  ;;  %v2402_v43 = vadd.f32 %v384_v42, %v2361_v20  ;;  %v386_v44 = vpop.f32.mrb[11].mxu0  ;;  %v524_v42 = vadd.s32 4294967280, %v2480_v36 }
 0x108   : > { %3279 = vst [vmem:[#allocation16_spill] sm:$0xff] %v2399_v41  ;;  %v2405_v45 = vadd.f32 %v386_v44, %v2365_v21  ;;  %476 = vperm.xlu0 %2192, %v2399_v41  }
 0x109   : > { %3280 = vst [vmem:[#allocation17_spill] sm:$0xff] %v2402_v43 }
 0x10a   : > { %479 = vperm.xlu1 %2193, %v2405_v45  }
 0x10c   : > { %v390_v46 = vpop.f32.mrb[12].mxu0 }
 0x10d   : > { %v2410_v47 = vadd.f32 %v390_v46, %v2361_v20  ;;  %v392_v48 = vpop.f32.mrb[13].mxu0  ;;  %v538_v46 = vadd.s32 4294967264, %v2480_v36 }
 0x10e   : > { %v2413_v49 = vadd.f32 %v392_v48, %v2365_v21  ;;  %v394_v50 = vpop.f32.mrb[14].mxu0 }
 0x10f   : > { %3281 = vst [vmem:[#allocation18_spill] sm:$0xff] %v2410_v47  ;;  %v2416_v51 = vadd.f32 %v394_v50, %v2361_v20  ;;  %v396_v52 = vpop.f32.mrb[15].mxu0  ;;  %v2490_v50 = vsub.s32 %v524_v42, %v2352_v16 }
 0x110   : > { %v2419_v53 = vadd.f32 %v396_v52, %v2365_v21  ;;  %482 = vperm.xlu0 %2192, %v2413_v49  }
 0x111   : > { %3282 = vst [vmem:[#allocation19_spill] sm:$0xff] %v2416_v51 }
 0x112   : > { %485 = vperm.xlu1 %2193, %v2419_v53  }
 0x114   : > { %v400_v54 = vpop.f32.mrb[16].mxu0 }
 0x115   : > { %v2424_v55 = vadd.f32 %v400_v54, %v2361_v20  ;;  %v402_v56 = vpop.f32.mrb[17].mxu0  ;;  %v545_v54 = vadd.s32 4294967256, %v2480_v36 }
 0x116   : > { %v2427_v57 = vadd.f32 %v402_v56, %v2365_v21  ;;  %v404_v58 = vpop.f32.mrb[18].mxu0 }
 0x117   : > { %3283 = vst [vmem:[#allocation20_spill] sm:$0xff] %v2424_v55  ;;  %v2430_v59 = vadd.f32 %v404_v58, %v2361_v20  ;;  %v406_v60 = vpop.f32.mrb[19].mxu0  ;;  %v2501_v58 = vsub.s32 %v538_v46, %v2352_v16  ;;  %v573_v46 = vadd.s32 4294967224, %v2480_v36 }
 0x118   : > { %v2433_v61 = vadd.f32 %v406_v60, %v2365_v21  ;;  %488 = vperm.xlu0 %2192, %v2427_v57   ;;  %v552_v60 = vadd.s32 4294967248, %v2480_v36 }
 0x119   : > { %3284 = vst [vmem:[#allocation21_spill] sm:$0xff] %v2430_v59 }
 0x11a   : > { %491 = vperm.xlu1 %2193, %v2433_v61  }
 0x11c   : > { %v410_v62 = vpop.f32.mrb[20].mxu0 }
 0x11d   : > { %v2438_v63 = vadd.f32 %v410_v62, %v2361_v20  ;;  %v412_v0 = vpop.f32.mrb[21].mxu0 }
 0x11e   : > { %v2441_v1 = vadd.f32 %v412_v0, %v2365_v21  ;;  %v414_v2 = vpop.f32.mrb[22].mxu0 }
 0x11f   : > { %3285 = vst [vmem:[#allocation22_spill] sm:$0xff] %v2438_v63  ;;  %v2444_v3 = vadd.f32 %v414_v2, %v2361_v20  ;;  %v416_v5 = vpop.f32.mrb[23].mxu0 }
 0x120   : > { %v2447_v6 = vadd.f32 %v416_v5, %v2365_v21  ;;  %494 = vperm.xlu0 %2192, %v2441_v1  }
 0x121   : > { %3286 = vst [vmem:[#allocation23_spill] sm:$0xff] %v2444_v3 }
 0x122   : > { %497 = vperm.xlu1 %2193, %v2447_v6  }
 0x124   : > { %v420_v7 = vpop.f32.mrb[24].mxu0 }
 0x125   : > { %v2452_v8 = vadd.f32 %v420_v7, %v2361_v20  ;;  %v422_v9 = vpop.f32.mrb[25].mxu0 }
 0x126   : > { %v2455_v10 = vadd.f32 %v422_v9, %v2365_v21  ;;  %v424_v11 = vpop.f32.mrb[26].mxu0  ;;  %v2509_v9 = vsub.s32 %v545_v54, %v2352_v16 }
 0x127   : > { %3287 = vst [vmem:[#allocation24_spill] sm:$0xff] %v2452_v8  ;;  %v2458_v12 = vadd.f32 %v424_v11, %v2361_v20  ;;  %v426_v13 = vpop.f32.mrb[27].mxu0  ;;  %v559_v11 = vadd.s32 4294967240, %v2480_v36 }
 0x128   : > { %v2461_v14 = vadd.f32 %v426_v13, %v2365_v21  ;;  %500 = vperm.xlu0 %2192, %v2455_v10  }
 0x129   : > { %3288 = vst [vmem:[#allocation25_spill] sm:$0xff] %v2458_v12 }
 0x12a   : > { %503 = vperm.xlu1 %2193, %v2461_v14  }
 0x12c   : > { %v430_v18 = vpop.f32.mrb[28].mxu0 }
 0x12d   : > { %v2466_v22 = vadd.f32 %v430_v18, %v2361_v20  ;;  %v432_v24 = vpop.f32.mrb[29].mxu0 }
 0x12e   : > { %v2469_v26 = vadd.f32 %v432_v24, %v2365_v21  ;;  %v434_v28 = vpop.f32.mrb[30].mxu0  ;;  %v2514_v24 = vsub.s32 %v552_v60, %v2352_v16 }
 0x12f   : > { %3289 = vst [vmem:[#allocation26_spill] sm:$0xff] %v2466_v22  ;;  %v2472_v30 = vadd.f32 %v434_v28, %v2361_v20  ;;  %v436_v32 = vpop.f32.mrb[31].mxu0  ;;  %v531_v20 = vadd.s32 4294967272, %v2480_v36  ;;  %v566_v28 = vadd.s32 4294967232, %v2480_v36 }
 0x130   : > { %v2475_v34 = vadd.f32 %v436_v32, %v2365_v21  ;;  %506 = vperm.xlu0 %2192, %v2469_v26   ;;  %v2487_v21 = vsub.s32 %v517_v40, %v2352_v16 }
 0x131   : > { %3290 = vst [vmem:[#allocation27_spill] sm:$0xff] %v2472_v30  ;;  %v2497_v52 = vsub.s32 %v531_v20, %v2352_v16  ;;  %v2522_v20 = vsub.s32 %v559_v11, %v2352_v16  ;;  %v2528_v60 = vsub.s32 %v566_v28, %v2352_v16  ;;  %v587_v11 = vadd.s32 4294967208, %v2480_v36 }
 0x132   : > { %509 = vperm.xlu1 %2193, %v2475_v34  }
 0x177   : > { %v465_v38 = vpop.permute.xlu0 %464 }
 0x178   : > { %v516_v5 = vrot.slane %v465_v38, %v2494_v15 }
 0x17b   : > { %v468_v48 = vpop.permute.xlu0 %467 }
 0x17c   : > { %v521_v62 = vrot.slane %v468_v48, %v2487_v21 }
 0x17e   : > { %v523_v32 = vsel %vm522_vm2, %v521_v62, %v516_v5  ;;  %v580_v62 = vadd.s32 4294967216, %v2480_v36 }
 0x17f   : > { %v471_v44 = vpop.permute.xlu1 %470 }
 0x180   : > { %v528_v2 = vrot.slane %v471_v44, %v2490_v50 }
 0x182   : > { %v530_v40 = vsel %vm529_vm3, %v528_v2, %v523_v32  ;;  %v2540_v32 = vsub.s32 %v580_v62, %v2352_v16 }
 0x183   : > { %v474_v56 = vpop.permute.xlu1 %473 }
 0x184   : > { %v535_v7 = vrot.slane %v474_v56, %v2497_v52 }
 0x186   : > { %v537_v42 = vsel %vm536_vm4, %v535_v7, %v530_v40  ;;  %v2534_v7 = vsub.s32 %v573_v46, %v2352_v16  ;;  %v2546_v46 = vsub.s32 %v587_v11, %v2352_v16 }
 0x187   : > { %v477_v0 = vpop.permute.xlu0 %476 }
 0x188   : > { %v542_v13 = vrot.slane %v477_v0, %v2501_v58 }
 0x189   : > { %v480_v18 = vpop.permute.xlu1 %479 }
 0x18a   : > { %v549_v44 = vrot.slane %v480_v18, %v2509_v9  ;;  %v544_v48 = vsel %vm543_vm5, %v542_v13, %v537_v42 }
 0x18c   : > { %v551_v2 = vsel %vm550_vm6, %v549_v44, %v544_v48  ;;  %v601_v48 = vadd.s32 4294967192, %v2480_v36 }
 0x18f   : > { %v483_v38 = vpop.permute.xlu0 %482 }
 0x190   : > { %v556_v54 = vrot.slane %v483_v38, %v2514_v24  ;;  %v594_v38 = vadd.s32 4294967200, %v2480_v36 }
 0x191   : > { %v486_v56 = vpop.permute.xlu1 %485 }
 0x192   : > { %v563_v5 = vrot.slane %v486_v56, %v2522_v20  ;;  %v558_v13 = vsel %vm557_vm7, %v556_v54, %v551_v2 }
 0x194   : > { %v565_v42 = vsel %vm3259_vm8, %v563_v5, %v558_v13  ;;  %v608_v5 = vadd.s32 4294967184, %v2480_v36 }
 0x196   : > { %v2564_v19 = vsub.s32 %v608_v5, %v2352_v16 }
 0x197   : > { %v489_v0 = vpop.permute.xlu0 %488 }
 0x198   : > { %v570_v18 = vrot.slane %v489_v0, %v2528_v60  ;;  %v2552_v0 = vsub.s32 %v594_v38, %v2352_v16  ;;  %v615_v38 = vadd.s32 4294967176, %v2480_v36  ;;  %v2577_v36 = vld [vmem:[%s193_s21] ss:$0 sm:$0xff] }
 0x199   : > { %v492_v28 = vpop.permute.xlu1 %491  ;;  %3291 = vst [vmem:[#allocation28_spill] sm:$0xff] %v2577_v36  ;;  %vm3269_vm1 = vcmp.eq.s32.totalorder %v2577_v36, %v2352_v16 }
 0x19a   : > { %v577_v44 = vrot.slane %v492_v28, %v2534_v7  ;;  %v572_v54 = vsel %vm3258_vm9, %v570_v18, %v565_v42  ;;  %v2558_v28 = vsub.s32 %v601_v48, %v2352_v16  ;;  %v2570_v48 = vsub.s32 %v615_v38, %v2352_v16  ;;  %v639_v38 = vld [vmem:[#allocation2] sm:$0xff] }
 0x19c   : > { %v579_v13 = vsel %vm3256_vm10, %v577_v44, %v572_v54  ;;  %vm627_vm10 = vcmask 1044484  }
 0x19f   : > { %v495_v40 = vpop.permute.xlu0 %494 }
 0x1a0   : > { %v584_v56 = vrot.slane %v495_v40, %v2540_v32 }
 0x1a1   : > { %v498_v62 = vpop.permute.xlu1 %497 }
 0x1a2   : > { %v591_v11 = vrot.slane %v498_v62, %v2546_v46  ;;  %v586_v18 = vsel %vm3254_vm11, %v584_v56, %v579_v13  ;;  %vm623_vm11 = vcmask 1042434  }
 0x1a4   : > { %v593_v44 = vsel %vm3253_vm12, %v591_v11, %v586_v18  ;;  %vm622_vm12 = vcmask 1041409  }
 0x1a7   : > { %v501_v2 = vpop.permute.xlu0 %500 }
 0x1a8   : > { %v598_v40 = vrot.slane %v501_v2, %v2552_v0 }
 0x1a9   : > { %v504_v42 = vpop.permute.xlu1 %503 }
 0x1aa   : > { %v605_v54 = vrot.slane %v504_v42, %v2558_v28  ;;  %v600_v62 = vsel %vm3252_vm13, %v598_v40, %v593_v44 }
 0x1ac   : > { %v607_v5 = vsel %vm3251_vm14, %v605_v54, %v600_v62  ;;  %vm644_vm14 = vcmask 7168   ;;  %v2259_v54 = vmov 0.0  }
 0x1af   : > { %v507_v56 = vpop.permute.xlu0 %506 }
 0x1b0   : > { %v612_v2 = vrot.slane %v507_v56, %v2564_v19 }
 0x1b1   : > { %v510_v13 = vpop.permute.xlu1 %509 }
 0x1b2   : > { %v619_v11 = vrot.slane %v510_v13, %v2570_v48  ;;  %v614_v18 = vsel %vm3255_vm15, %v612_v2, %v607_v5  ;;  %vm625_vm15 = vcmask 1043459  }
 0x1b4   : > { %v621_v40 = vsel %vm3257_vm0, %v619_v11, %v614_v18  ;;  %vm629_vm0 = vcmask 1045509  }
 0x1b5   : > { %v636_v42 = vsel %vm3269_vm1, %v621_v40, -1e+30 }
 0x1b6   : > { %637 = vmax.xlane.f32.xlu0 %v636_v42 }
 0x243   : > { %v638_v44 = vpop.xlane.xlu0 %637 }
 0x244   : > { %v640_v56 = vmax.f32 %v639_v38, %v638_v44 }
 0x246   : > { %vm641_vm13 = vcmp.gt.f32.partialorder %v640_v56, %v639_v38 }
 0x247   : > { %v2163_v62 = vsel %vm641_vm13, 1.0, %v2259_v54 }
 0x248   : > { %v645_v13 = vsel %vm644_vm14, %v2163_v62, -inf }
 0x249   : > { %646 = vmax.xlane.f32.xlu1 %v645_v13 }
 0x2d6   : > { %v647_v2 = vpop.xlane.xlu1 %646 }
 0x2d7   : > { %v648_v5 = vrot.slane %v647_v2, 4 }
 0x2d9   : > { %v649_v11 = vmax.f32 %v647_v2, %v648_v5 }
 0x2db   : > { %v650_v18 = vrot.slane %v649_v11, 2 }
 0x2dd   : > { %v651_v40 = vmax.f32 %v649_v11, %v650_v18 }
 0x2df   : > { %v652_v42 = vrot.slane %v651_v40, 1 }
 0x2e1   : > { %v653_v44 = vmax.f32 %v651_v40, %v652_v42 }
 0x2e3   : > { %2169 = vpush %v653_v44 }
 0x314   : > { %s2170_s12 = spop %2169 }
 0x315   : > { %p655_p6 = scmp.gt.f32.partialorder %s2170_s12, 0.0 }
 0x316   : > { %v661_v54 = vsub.f32 (%p655_p6), %v639_v38, %v640_v56  ;;  %673 = vst.msk [vmem:[#allocation2] sm:$0xff] (%p655_p6), %vm644_vm14, %v640_v56  ;;  %v2260_v62 = vmov (%p655_p6), 0   ;;  %v659_v4 = vld [vmem:[#allocation3] sm:$0xff] (%p655_p6)  ;;  %v660_v36 = vld [vmem:[#allocation3 + $0x8] sm:$0xff] (%p655_p6) }
 0x317   : > { %658 = sbr.rel (!%p655_p6) target bundleno = 936 (0x3a8), region = 44  ;;  %2208 = vset.pattern.permute.xlu0 (%p655_p6), %v2260_v62 }
 0x318   : > { %v662_v13 = vmul.f32 (%p655_p6), 1.442695, %v661_v54 }
 0x31a   : > { %2209 = vpow2.f32 (%p655_p6), %v662_v13 }
 0x324   : > { %v2210_v17 = vpop.eup %2209 }
 0x325   : > { %666 = vperm.xlu0 %2208, %v2210_v17  }
 0x3a4   : > { %v667_v2 = vpop.permute.xlu0 %666 }
 0x3a5   : > { %v669_v5 = vmul.f32 %v667_v2, %v659_v4  ;;  %v670_v11 = vmul.f32 %v667_v2, %v660_v36 }
 0x3a7   : > { %671 = vst [vmem:[#allocation3] sm:$0xff] %v669_v5  ;;  %672 = vst [vmem:[#allocation3 + $0x8] sm:$0xff] %v670_v11 }
 0x3a8 PF: > { %v3292_v18 = vmov 0   ;;  %v3293_v40 = vsub.s32 0, %v2352_v16  ;;  %vm3295_vm13 = vcmask 523712   ;;  %vm3296_vm14 = vcmask 589312   ;;  %p2164_p7 = scmp.ne.s32.totalorder %s2294_s16, 1 }
 0x3a9   : > { %2211 = vset.pattern.permute.xlu0 %v3292_v18  ;;  %2212 = vset.pattern.permute.xlu1 %v3292_v18  ;;  %vm3297_vm1 = vcmask 654912  }
 0x3aa   : > { %676 = vperm.xlu0 %2211, %v640_v56   ;;  %2052 = vmatprep.mubr.bf16.mxu1 %v3292_v18 }
 0x429   : > { %v2594_v38 = vpop.permute.xlu0 %676 }
 0x42a   : > { %v681_v17 = vrot.slane %v2594_v38, %v3293_v40 }
 0x42c   : > { %v719_v42 = vsub.f32 %v2378_v29, %v681_v17  ;;  %v718_v4 = vsub.f32 %v2371_v25, %v681_v17  ;;  %v720_v36 = vsub.f32 %v2385_v33, %v681_v17  ;;  %v721_v44 = vsub.f32 %v2392_v37, %v681_v17 }
 0x42d   : > { %v722_v56 = vsub.f32 %v2399_v41, %v681_v17  ;;  %v723_v54 = vsub.f32 %v2405_v45, %v681_v17  ;;  %v724_v62 = vsub.f32 %v2413_v49, %v681_v17  ;;  %v725_v13 = vsub.f32 %v2419_v53, %v681_v17 }
 0x42e   : > { %978 = vperm.xlu1 %2212, %v719_v42   ;;  %975 = vperm.xlu0 %2211, %v718_v4   ;;  %v726_v2 = vsub.f32 %v2427_v57, %v681_v17  ;;  %v727_v5 = vsub.f32 %v2433_v61, %v681_v17  ;;  %v728_v11 = vsub.f32 %v2441_v1, %v681_v17  ;;  %v3294_v4 = vsub.s32 1, %v2352_v16 }
 0x42f   : > { %v729_v18 = vsub.f32 %v2447_v6, %v681_v17  ;;  %v730_v40 = vsub.f32 %v2455_v10, %v681_v17  ;;  %v731_v42 = vsub.f32 %v2461_v14, %v681_v17 }
 0x432   : > { %981 = vperm.xlu1 %2212, %v720_v36   ;;  %984 = vperm.xlu0 %2211, %v721_v44   ;;  %v685_v36 = vrot.slane %v2594_v38, %v3294_v4  ;;  %v732_v44 = vsub.f32 %v2469_v26, %v681_v17 }
 0x434   : > { %v744_v4 = vsub.f32 %v2441_v1, %v685_v36 }
 0x436   : > { %987 = vperm.xlu1 %2212, %v722_v56   ;;  %990 = vperm.xlu0 %2211, %v723_v54   ;;  %v733_v56 = vsub.f32 %v2475_v34, %v681_v17  ;;  %v734_v54 = vsub.f32 %v2371_v25, %v685_v36  ;;  %v740_v17 = vsub.f32 %v2413_v49, %v685_v36 }
 0x43a   : > { %993 = vperm.xlu1 %2212, %v724_v62   ;;  %996 = vperm.xlu0 %2211, %v725_v13   ;;  %v735_v62 = vsub.f32 %v2378_v29, %v685_v36  ;;  %v736_v13 = vsub.f32 %v2385_v33, %v685_v36 }
 0x43e   : > { %999 = vperm.xlu1 %2212, %v726_v2   ;;  %1002 = vperm.xlu0 %2211, %v727_v5   ;;  %v737_v2 = vsub.f32 %v2392_v37, %v685_v36  ;;  %v738_v5 = vsub.f32 %v2399_v41, %v685_v36 }
 0x442   : > { %1005 = vperm.xlu1 %2212, %v728_v11   ;;  %1008 = vperm.xlu0 %2211, %v729_v18   ;;  %v739_v11 = vsub.f32 %v2405_v45, %v685_v36  ;;  %v741_v18 = vsub.f32 %v2419_v53, %v685_v36 }
 0x446   : > { %1011 = vperm.xlu1 %2212, %v730_v40   ;;  %1014 = vperm.xlu0 %2211, %v731_v42   ;;  %v742_v40 = vsub.f32 %v2427_v57, %v685_v36  ;;  %v743_v42 = vsub.f32 %v2433_v61, %v685_v36 }
 0x44a   : > { %1017 = vperm.xlu1 %2212, %v732_v44   ;;  %1020 = vperm.xlu0 %2211, %v733_v56   ;;  %v745_v44 = vsub.f32 %v2447_v6, %v685_v36  ;;  %v688_v56 = vsub.s32 2, %v2352_v16 }
 0x44e   : > { %1023 = vperm.xlu1 %2212, %v734_v54   ;;  %1026 = vperm.xlu0 %2211, %v735_v62   ;;  %v746_v54 = vsub.f32 %v2455_v10, %v685_v36  ;;  %v747_v62 = vsub.f32 %v2461_v14, %v685_v36 }
 0x452   : > { %1029 = vperm.xlu1 %2212, %v736_v13   ;;  %1032 = vperm.xlu0 %2211, %v737_v2   ;;  %v689_v13 = vrot.slane %v2594_v38, %v688_v56  ;;  %v748_v2 = vsub.f32 %v2469_v26, %v685_v36 }
 0x454   : > { %v759_v56 = vsub.f32 %v2433_v61, %v689_v13 }
 0x456   : > { %1035 = vperm.xlu1 %2212, %v738_v5   ;;  %1038 = vperm.xlu0 %2211, %v739_v11   ;;  %v749_v5 = vsub.f32 %v2475_v34, %v685_v36  ;;  %v751_v11 = vsub.f32 %v2378_v29, %v689_v13  ;;  %v757_v36 = vsub.f32 %v2419_v53, %v689_v13 }
 0x45a   : > { %1041 = vperm.xlu1 %2212, %v740_v17   ;;  %1044 = vperm.xlu0 %2211, %v741_v18   ;;  %v750_v17 = vsub.f32 %v2371_v25, %v689_v13  ;;  %v753_v18 = vsub.f32 %v2392_v37, %v689_v13 }
 0x45e   : > { %1047 = vperm.xlu1 %2212, %v742_v40   ;;  %1050 = vperm.xlu0 %2211, %v743_v42   ;;  %v752_v40 = vsub.f32 %v2385_v33, %v689_v13  ;;  %v755_v42 = vsub.f32 %v2405_v45, %v689_v13 }
 0x462   : > { %1053 = vperm.xlu1 %2212, %v744_v4   ;;  %1056 = vperm.xlu0 %2211, %v745_v44   ;;  %v754_v4 = vsub.f32 %v2399_v41, %v689_v13  ;;  %v756_v44 = vsub.f32 %v2413_v49, %v689_v13 }
 0x466   : > { %1059 = vperm.xlu1 %2212, %v746_v54   ;;  %1062 = vperm.xlu0 %2211, %v747_v62   ;;  %v758_v54 = vsub.f32 %v2427_v57, %v689_v13  ;;  %v761_v62 = vsub.f32 %v2447_v6, %v689_v13 }
 0x46a   : > { %1065 = vperm.xlu1 %2212, %v748_v2   ;;  %1068 = vperm.xlu0 %2211, %v749_v5   ;;  %v760_v2 = vsub.f32 %v2441_v1, %v689_v13  ;;  %v692_v5 = vsub.s32 3, %v2352_v16 }
 0x46e   : > { %1074 = vperm.xlu0 %2211, %v751_v11   ;;  %1071 = vperm.xlu1 %2212, %v750_v17   ;;  %v763_v11 = vsub.f32 %v2461_v14, %v689_v13  ;;  %v762_v17 = vsub.f32 %v2455_v10, %v689_v13 }
 0x472   : > { %1080 = vperm.xlu0 %2211, %v753_v18   ;;  %1077 = vperm.xlu1 %2212, %v752_v40   ;;  %v2652_v18 = vrot.slane %v2594_v38, %v692_v5  ;;  %v696_v40 = vsub.s32 4, %v2352_v16 }
 0x474   : > { %v769_v5 = vsub.f32 %v2392_v37, %v2652_v18  ;;  %v773_v22 = vsub.f32 %v2419_v53, %v2652_v18  ;;  %v774_v51 = vsub.f32 %v2427_v57, %v2652_v18  ;;  %v775_v31 = vsub.f32 %v2433_v61, %v2652_v18 }
 0x476   : > { %1086 = vperm.xlu0 %2211, %v755_v42   ;;  %1083 = vperm.xlu1 %2212, %v754_v4   ;;  %v765_v42 = vsub.f32 %v2475_v34, %v689_v13  ;;  %v764_v4 = vsub.f32 %v2469_v26, %v689_v13  ;;  %v768_v13 = vsub.f32 %v2385_v33, %v2652_v18 }
 0x47a   : > { %1092 = vperm.xlu0 %2211, %v757_v36   ;;  %1089 = vperm.xlu1 %2212, %v756_v44   ;;  %v2658_v36 = vrot.slane %v2594_v38, %v696_v40  ;;  %v767_v44 = vsub.f32 %v2378_v29, %v2652_v18 }
 0x47c   : > { %v784_v40 = vsub.f32 %v2385_v33, %v2658_v36  ;;  %v788_v3 = vsub.f32 %v2413_v49, %v2658_v36  ;;  %v789_v55 = vsub.f32 %v2419_v53, %v2658_v36 }
 0x47e   : > { %1098 = vperm.xlu0 %2211, %v759_v56   ;;  %1095 = vperm.xlu1 %2212, %v758_v54   ;;  %v766_v56 = vsub.f32 %v2371_v25, %v2652_v18  ;;  %v700_v54 = vsub.s32 5, %v2352_v16 }
 0x482   : > { %1104 = vperm.xlu0 %2211, %v761_v62   ;;  %1101 = vperm.xlu1 %2212, %v760_v2   ;;  %v782_v62 = vsub.f32 %v2371_v25, %v2658_v36  ;;  %v2670_v2 = vrot.slane %v2594_v38, %v700_v54 }
 0x484   : > { %v800_v54 = vsub.f32 %v2385_v33, %v2670_v2  ;;  %v802_v30 = vsub.f32 %v2399_v41, %v2670_v2  ;;  %v803_v8 = vsub.f32 %v2405_v45, %v2670_v2  ;;  %v804_v43 = vsub.f32 %v2413_v49, %v2670_v2 }
 0x486   : > { %1110 = vperm.xlu0 %2211, %v763_v11   ;;  %1107 = vperm.xlu1 %2212, %v762_v17   ;;  %v783_v11 = vsub.f32 %v2378_v29, %v2658_v36  ;;  %v798_v17 = vsub.f32 %v2371_v25, %v2670_v2 }
 0x48a   : > { %1116 = vperm.xlu0 %2211, %v765_v42   ;;  %1113 = vperm.xlu1 %2212, %v764_v4   ;;  %v704_v42 = vsub.s32 6, %v2352_v16  ;;  %v770_v4 = vsub.f32 %v2399_v41, %v2652_v18 }
 0x48e   : > { %1122 = vperm.xlu0 %2211, %v767_v44   ;;  %1119 = vperm.xlu1 %2212, %v766_v56   ;;  %v799_v44 = vsub.f32 %v2378_v29, %v2670_v2  ;;  %v2686_v56 = vrot.slane %v2594_v38, %v704_v42 }
 0x490   : > { %v818_v59 = vsub.f32 %v2399_v41, %v2686_v56  ;;  %v819_v47 = vsub.f32 %v2405_v45, %v2686_v56 }
 0x492   : > { %1167 = vperm.xlu0 %2211, %v782_v62   ;;  %1125 = vperm.xlu1 %2212, %v768_v13   ;;  %v785_v62 = vsub.f32 %v2392_v37, %v2658_v36  ;;  %v815_v13 = vsub.f32 %v2378_v29, %v2686_v56 }
 0x496   : > { %1128 = vperm.xlu0 %2211, %v769_v5   ;;  %1170 = vperm.xlu1 %2212, %v783_v11   ;;  %v814_v5 = vsub.f32 %v2371_v25, %v2686_v56  ;;  %v708_v11 = vsub.s32 7, %v2352_v16  ;;  %v817_v16 = vsub.f32 %v2392_v37, %v2686_v56 }
 0x498   : > { %v2702_v42 = vrot.slane %v2594_v38, %v708_v11 }
 0x49a   : > { %1215 = vperm.xlu0 %2211, %v798_v17   ;;  %1173 = vperm.xlu1 %2212, %v784_v40   ;;  %v786_v17 = vsub.f32 %v2399_v41, %v2658_v36  ;;  %v771_v40 = vsub.f32 %v2405_v45, %v2652_v18  ;;  %v832_v12 = vsub.f32 %v2385_v33, %v2702_v42 }
 0x49b   : > { %v833_v63 = vsub.f32 %v2392_v37, %v2702_v42 }
 0x49e   : > { %1131 = vperm.xlu0 %2211, %v770_v4   ;;  %1218 = vperm.xlu1 %2212, %v799_v44   ;;  %v816_v4 = vsub.f32 %v2385_v33, %v2686_v56  ;;  %v801_v44 = vsub.f32 %v2392_v37, %v2670_v2 }
 0x4a2   : > { %1221 = vperm.xlu0 %2211, %v800_v54   ;;  %1176 = vperm.xlu1 %2212, %v785_v62  }
 0x4a6   : > { %1266 = vperm.xlu0 %2211, %v815_v13   ;;  %1263 = vperm.xlu1 %2212, %v814_v5   ;;  %v831_v13 = vsub.f32 %v2378_v29, %v2702_v42  ;;  %v830_v5 = vsub.f32 %v2371_v25, %v2702_v42 }
 0x4aa   : > { %1179 = vperm.xlu0 %2211, %v786_v17   ;;  %1134 = vperm.xlu1 %2212, %v771_v40   ;;  %v787_v17 = vsub.f32 %v2405_v45, %v2658_v36  ;;  %v772_v40 = vsub.f32 %v2413_v49, %v2652_v18 }
 0x4ad   : > { %v2708_v54 = vpop.permute.xlu1 %978  ;;  %v2710_v62 = vpop.permute.xlu0 %975 }
 0x4ae   : > { %1269 = vperm.xlu0 %2211, %v816_v4   ;;  %1224 = vperm.xlu1 %2212, %v801_v44  }
 0x4b1   : > { %v2716_v38 = vpop.permute.xlu1 %981  ;;  %v2718_v11 = vpop.permute.xlu0 %984 }
 0x4b2   : > { %1314 = vperm.xlu0 %2211, %v831_v13   ;;  %1311 = vperm.xlu1 %2212, %v830_v5  }
 0x4b5   : > { %v2724_v4 = vpop.permute.xlu1 %987  ;;  %v2726_v44 = vpop.permute.xlu0 %990 }
 0x4b6   : > { %1182 = vperm.xlu0 %2211, %v787_v17   ;;  %1137 = vperm.xlu1 %2212, %v772_v40  }
 0x4b9   : > { %v2732_v13 = vpop.permute.xlu1 %993  ;;  %v2734_v5 = vpop.permute.xlu0 %996 }
 0x4ba   : > { %1272 = vperm.xlu0 %2211, %v817_v16   ;;  %1227 = vperm.xlu1 %2212, %v802_v30  }
 0x4bd   : > { %v2740_v17 = vpop.permute.xlu1 %999  ;;  %v2742_v40 = vpop.permute.xlu0 %1002 }
 0x4be   : > { %1140 = vperm.xlu0 %2211, %v773_v22   ;;  %1317 = vperm.xlu1 %2212, %v832_v12  }
 0x4c1   : > { %v2748_v16 = vpop.permute.xlu1 %1005  ;;  %v2750_v30 = vpop.permute.xlu0 %1008 }
 0x4c2   : > { %1230 = vperm.xlu0 %2211, %v803_v8   ;;  %1185 = vperm.xlu1 %2212, %v788_v3  }
 0x4c5   : > { %v2756_v22 = vpop.permute.xlu1 %1011  ;;  %v2758_v12 = vpop.permute.xlu0 %1014 }
 0x4c6   : > { %1320 = vperm.xlu0 %2211, %v833_v63   ;;  %1275 = vperm.xlu1 %2212, %v818_v59  }
 0x4c9   : > { %v2764_v8 = vpop.permute.xlu1 %1017  ;;  %v2766_v3 = vpop.permute.xlu0 %1020 }
 0x4ca   : > { %1188 = vperm.xlu0 %2211, %v789_v55   ;;  %1143 = vperm.xlu1 %2212, %v774_v51   ;;  %v834_v51 = vsub.f32 %v2399_v41, %v2702_v42 }
 0x4cd   : > { %v1024_v63 = vpop.permute.xlu1 %1023  ;;  %v1027_v59 = vpop.permute.xlu0 %1026 }
 0x4ce   : > { %1278 = vperm.xlu0 %2211, %v819_v47   ;;  %1233 = vperm.xlu1 %2212, %v804_v43   ;;  %v1440_v39 = vrot.slane %v1024_v63, %v2494_v15  ;;  %v1444_v35 = vrot.slane %v1027_v59, %v2487_v21  ;;  %v805_v63 = vsub.f32 %v2419_v53, %v2670_v2 }
 0x4cf   : > { %v790_v59 = vsub.f32 %v2427_v57, %v2658_v36 }
 0x4d0   : > { %v1445_v27 = vsel %vm522_vm2, %v1444_v35, %v1440_v39 }
 0x4d1   : > { %v1030_v55 = vpop.permute.xlu1 %1029  ;;  %v1033_v37 = vpop.permute.xlu0 %1032 }
 0x4d2   : > { %v1449_v33 = vrot.slane %v1030_v55, %v2490_v50  ;;  %1146 = vperm.xlu0 %2211, %v775_v31   ;;  %1323 = vperm.xlu1 %2212, %v834_v51   ;;  %v1454_v43 = vrot.slane %v1033_v37, %v2497_v52 }
 0x4d4   : > { %v1450_v47 = vsel %vm529_vm3, %v1449_v33, %v1445_v27  ;;  %v835_v27 = vsub.f32 %v2405_v45, %v2702_v42  ;;  %v820_v33 = vsub.f32 %v2413_v49, %v2686_v56 }
 0x4d5   : > { %v1036_v23 = vpop.permute.xlu1 %1035  ;;  %v1039_v41 = vpop.permute.xlu0 %1038  ;;  %v1455_v31 = vsel %vm536_vm4, %v1454_v43, %v1450_v47  ;;  %v776_v47 = vsub.f32 %v2441_v1, %v2652_v18 }
 0x4d6   : > { %v1459_v29 = vrot.slane %v1036_v23, %v2501_v58  ;;  %1236 = vperm.xlu0 %2211, %v805_v63   ;;  %1191 = vperm.xlu1 %2212, %v790_v59   ;;  %v1464_v35 = vrot.slane %v1039_v41, %v2509_v9 }
 0x4d8   : > { %v1460_v37 = vsel %vm543_vm5, %v1459_v29, %v1455_v31  ;;  %v791_v29 = vsub.f32 %v2433_v61, %v2658_v36 }
 0x4d9   : > { %v1042_v39 = vpop.permute.xlu1 %1041  ;;  %v1045_v51 = vpop.permute.xlu0 %1044  ;;  %v1465_v23 = vsel %vm550_vm6, %v1464_v35, %v1460_v37 }
 0x4da   : > { %v1469_v55 = vrot.slane %v1042_v39, %v2514_v24  ;;  %1326 = vperm.xlu0 %2211, %v835_v27   ;;  %1281 = vperm.xlu1 %2212, %v820_v33   ;;  %v1474_v43 = vrot.slane %v1045_v51, %v2522_v20  ;;  %v821_v33 = vsub.f32 %v2419_v53, %v2686_v56 }
 0x4db   : > { %v806_v39 = vsub.f32 %v2427_v57, %v2670_v2 }
 0x4dc   : > { %v1470_v41 = vsel %vm557_vm7, %v1469_v55, %v1465_v23 }
 0x4dd   : > { %v1048_v63 = vpop.permute.xlu1 %1047  ;;  %v1051_v59 = vpop.permute.xlu0 %1050  ;;  %v1475_v27 = vsel %vm3295_vm13, %v1474_v43, %v1470_v41  ;;  %vm3298_vm13 = vcmask 720512  }
 0x4de   : > { %v1479_v31 = vrot.slane %v1048_v63, %v2528_v60  ;;  %1194 = vperm.xlu0 %2211, %v791_v29   ;;  %1149 = vperm.xlu1 %2212, %v776_v47   ;;  %v1484_v35 = vrot.slane %v1051_v59, %v2534_v7  ;;  %v777_v47 = vsub.f32 %v2447_v6, %v2652_v18 }
 0x4df   : > { %v836_v63 = vsub.f32 %v2413_v49, %v2702_v42 }
 0x4e0   : > { %v1480_v37 = vsel %vm3296_vm14, %v1479_v31, %v1475_v27  ;;  %vm3299_vm14 = vcmask 786112  }
 0x4e1   : > { %v1054_v51 = vpop.permute.xlu1 %1053  ;;  %v1057_v55 = vpop.permute.xlu0 %1056  ;;  %v1485_v29 = vsel %vm3297_vm1, %v1484_v35, %v1480_v37  ;;  %vm3300_vm1 = vcmask 851712  }
 0x4e2   : > { %v1489_v23 = vrot.slane %v1054_v51, %v2540_v32  ;;  %1284 = vperm.xlu0 %2211, %v821_v33   ;;  %1239 = vperm.xlu1 %2212, %v806_v39   ;;  %v1494_v43 = vrot.slane %v1057_v55, %v2546_v46  ;;  %v807_v39 = vsub.f32 %v2433_v61, %v2670_v2 }
 0x4e3   : > { %v792_v51 = vsub.f32 %v2441_v1, %v2658_v36 }
 0x4e4   : > { %v1490_v41 = vsel %vm3298_vm13, %v1489_v23, %v1485_v29  ;;  %vm3301_vm13 = vcmask 917312  }
 0x4e5   : > { %v1060_v59 = vpop.permute.xlu1 %1059  ;;  %v1063_v31 = vpop.permute.xlu0 %1062  ;;  %v1495_v33 = vsel %vm3299_vm14, %v1494_v43, %v1490_v41  ;;  %v837_v41 = vsub.f32 %v2419_v53, %v2702_v42  ;;  %vm3302_vm14 = vcmask 982912  }
 0x4e6   : > { %v1499_v27 = vrot.slane %v1060_v59, %v2552_v0  ;;  %1152 = vperm.xlu0 %2211, %v777_v47   ;;  %1329 = vperm.xlu1 %2212, %v836_v63   ;;  %v1504_v35 = vrot.slane %v1063_v31, %v2558_v28  ;;  %v1365_v47 = vrot.slane %v2708_v54, %v2487_v21 }
 0x4e7   : > { %v1361_v63 = vrot.slane %v2710_v62, %v2494_v15  ;;  %v793_v62 = vsub.f32 %v2447_v6, %v2658_v36 }
 0x4e8   : > { %v1500_v37 = vsel %vm3300_vm1, %v1499_v27, %v1495_v33  ;;  %v822_v27 = vsub.f32 %v2427_v57, %v2686_v56  ;;  %v1370_v33 = vrot.slane %v2716_v38, %v2490_v50  ;;  %vm3303_vm1 = vcmask 1048512  }
 0x4e9   : > { %v1066_v55 = vpop.permute.xlu1 %1065  ;;  %v1069_v23 = vpop.permute.xlu0 %1068  ;;  %v1505_v43 = vsel %vm3301_vm13, %v1504_v35, %v1500_v37  ;;  %vm3304_vm13 = vcmask 523712  }
 0x4ea   : > { %v1509_v29 = vrot.slane %v1066_v55, %v2564_v19  ;;  %v1514_v59 = vrot.slane %v1069_v23, %v2570_v48  ;;  %1242 = vperm.xlu0 %2211, %v807_v39   ;;  %1197 = vperm.xlu1 %2212, %v792_v51   ;;  %v1366_v55 = vsel %vm522_vm2, %v1365_v47, %v1361_v63 }
 0x4eb   : > { %v1375_v23 = vrot.slane %v2718_v11, %v2497_v52  ;;  %v823_v11 = vsub.f32 %v2433_v61, %v2686_v56  ;;  %v1385_v63 = vrot.slane %v2726_v44, %v2509_v9  ;;  %v779_v44 = vsub.f32 %v2461_v14, %v2652_v18 }
 0x4ec   : > { %v1510_v31 = vsel %vm3302_vm14, %v1509_v29, %v1505_v43  ;;  %v778_v29 = vsub.f32 %v2455_v10, %v2652_v18  ;;  %v1380_v43 = vrot.slane %v2724_v4, %v2501_v58  ;;  %v808_v4 = vsub.f32 %v2441_v1, %v2670_v2 }
 0x4ed   : > { %v2841_v39 = vsel %vm3303_vm1, %v1514_v59, %v1510_v31  ;;  %v1075_v35 = vpop.permute.xlu0 %1074  ;;  %v1072_v37 = vpop.permute.xlu1 %1071  ;;  %v1371_v59 = vsel %vm529_vm3, %v1370_v33, %v1366_v55  ;;  %vm3305_vm14 = vcmask 589312   ;;  %vm3306_vm1 = vmmov %vm3304_vm13 }
 0x4ee   : > { %v1523_v51 = vrot.slane %v1075_v35, %v2487_v21  ;;  %v1519_v54 = vrot.slane %v1072_v37, %v2494_v15  ;;  %1332 = vperm.xlu0 %2211, %v837_v41   ;;  %1287 = vperm.xlu1 %2212, %v822_v27   ;;  %v1376_v47 = vsel %vm536_vm4, %v1375_v23, %v1371_v59 }
 0x4ef   : > { %v1381_v37 = vsel %vm543_vm5, %v1380_v43, %v1376_v47  ;;  %v1395_v59 = vrot.slane %v2734_v5, %v2522_v20  ;;  %v838_v43 = vsub.f32 %v2427_v57, %v2702_v42  ;;  %v809_v5 = vsub.f32 %v2447_v6, %v2670_v2 }
 0x4f0   : > { %v1524_v38 = vsel %vm522_vm2, %v1523_v51, %v1519_v54  ;;  %v1390_v51 = vrot.slane %v2732_v13, %v2514_v24 }
 0x4f1   : > { %v1081_v41 = vpop.permute.xlu0 %1080  ;;  %v1078_v31 = vpop.permute.xlu1 %1077 }
 0x4f2   : > { %v1533_v27 = vrot.slane %v1081_v41, %v2497_v52  ;;  %v1528_v35 = vrot.slane %v1078_v31, %v2490_v50  ;;  %1200 = vperm.xlu0 %2211, %v793_v62   ;;  %1155 = vperm.xlu1 %2212, %v778_v29   ;;  %v1400_v31 = vrot.slane %v2740_v17, %v2528_v60 }
 0x4f4   : > { %v1529_v33 = vsel %vm529_vm3, %v1528_v35, %v1524_v38  ;;  %v1386_v38 = vsel %vm550_vm6, %v1385_v63, %v1381_v37  ;;  %v794_v37 = vsub.f32 %v2455_v10, %v2658_v36 }
 0x4f5   : > { %v1087_v54 = vpop.permute.xlu0 %1086  ;;  %v1534_v62 = vsel %vm536_vm4, %v1533_v27, %v1529_v33  ;;  %v1084_v55 = vpop.permute.xlu1 %1083  ;;  %v1391_v41 = vsel %vm557_vm7, %v1390_v51, %v1386_v38 }
 0x4f6   : > { %v1543_v29 = vrot.slane %v1087_v54, %v2509_v9  ;;  %v1538_v23 = vrot.slane %v1084_v55, %v2501_v58  ;;  %1290 = vperm.xlu0 %2211, %v823_v11   ;;  %1245 = vperm.xlu1 %2212, %v808_v4   ;;  %v1396_v33 = vsel %vm3304_vm13, %v1395_v59, %v1391_v41  ;;  %vm3307_vm13 = vcmask 654912  }
 0x4f7   : > { %v1405_v4 = vrot.slane %v2742_v40, %v2534_v7  ;;  %v1401_v51 = vsel %vm3305_vm14, %v1400_v31, %v1396_v33  ;;  %v1410_v54 = vrot.slane %v2748_v16, %v2540_v32  ;;  %v839_v40 = vsub.f32 %v2433_v61, %v2702_v42  ;;  %vm3309_vm8 = vmmov %vm3307_vm13 }
 0x4f8   : > { %v1539_v13 = vsel %vm543_vm5, %v1538_v23, %v1534_v62  ;;  %v1415_v59 = vrot.slane %v2750_v30, %v2546_v46  ;;  %v1420_v41 = vrot.slane %v2756_v22, %v2552_v0  ;;  %v795_v30 = vsub.f32 %v2461_v14, %v2658_v36 }
 0x4f9   : > { %v1093_v27 = vpop.permute.xlu0 %1092  ;;  %v1544_v35 = vsel %vm550_vm6, %v1543_v29, %v1539_v13  ;;  %v1090_v11 = vpop.permute.xlu1 %1089  ;;  %v1406_v38 = vsel %vm3307_vm13, %v1405_v4, %v1401_v51  ;;  %v824_v13 = vsub.f32 %v2441_v1, %v2686_v56  ;;  %vm3310_vm13 = vcmask 786112  }
 0x4fa   : > { %v1553_v47 = vrot.slane %v1093_v27, %v2522_v20  ;;  %v1548_v63 = vrot.slane %v1090_v11, %v2514_v24  ;;  %1158 = vperm.xlu0 %2211, %v779_v44   ;;  %1335 = vperm.xlu1 %2212, %v838_v43   ;;  %v780_v33 = vsub.f32 %v2469_v26, %v2652_v18 }
 0x4fc   : > { %v1549_v17 = vsel %vm557_vm7, %v1548_v63, %v1544_v35 }
 0x4fd   : > { %v1099_v62 = vpop.permute.xlu0 %1098  ;;  %v1554_v55 = vsel %vm3306_vm1, %v1553_v47, %v1549_v17  ;;  %v1096_v29 = vpop.permute.xlu1 %1095  ;;  %vm3308_vm1 = vcmask 720512   ;;  %v1430_v17 = vrot.slane %v2764_v8, %v2564_v19 }
 0x4fe   : > { %v1563_v23 = vrot.slane %v1099_v62, %v2534_v7  ;;  %v1558_v44 = vrot.slane %v1096_v29, %v2528_v60  ;;  %1248 = vperm.xlu0 %2211, %v809_v5   ;;  %1203 = vperm.xlu1 %2212, %v794_v37   ;;  %v1411_v43 = vsel %vm3308_vm1, %v1410_v54, %v1406_v38 }
 0x4ff   : > { %v1416_v63 = vsel %vm3310_vm13, %v1415_v59, %v1411_v43  ;;  %v1425_v5 = vrot.slane %v2758_v12, %v2558_v28  ;;  %v825_v12 = vsub.f32 %v2447_v6, %v2686_v56 }
 0x500   : > { %v1559_v16 = vsel %vm3305_vm14, %v1558_v44, %v1554_v55  ;;  %vm3311_vm14 = vmmov %vm3308_vm1  ;;  %v810_v44 = vsub.f32 %v2455_v10, %v2670_v2 }
 0x501   : > { %v1105_v31 = vpop.permute.xlu0 %1104  ;;  %v1564_v27 = vsel %vm3309_vm8, %v1563_v23, %v1559_v16  ;;  %v1102_v35 = vpop.permute.xlu1 %1101  ;;  %vm3312_vm8 = vcmask 851712   ;;  %vm3313_vm1 = vmmov %vm3310_vm13  ;;  %vm3314_vm13 = vcmask 917312   ;;  %v1435_v23 = vrot.slane %v2766_v3, %v2570_v48 }
 0x502   : > { %v1573_v11 = vrot.slane %v1105_v31, %v2546_v46  ;;  %v1568_v47 = vrot.slane %v1102_v35, %v2540_v32  ;;  %1338 = vperm.xlu0 %2211, %v839_v40   ;;  %1293 = vperm.xlu1 %2212, %v824_v13   ;;  %v1421_v4 = vsel %vm3312_vm8, %v1420_v41, %v1416_v63 }
 0x503   : > { %v1426_v29 = vsel %vm3314_vm13, %v1425_v5, %v1421_v4  ;;  %v781_v31 = vsub.f32 %v2475_v34, %v2652_v18 }
 0x504   : > { %v1569_v22 = vsel %vm3311_vm14, %v1568_v47, %v1564_v27  ;;  %vm3315_vm14 = vmmov %vm3312_vm8  ;;  %vm3316_vm8 = vcmask 982912   ;;  %v840_v27 = vsub.f32 %v2441_v1, %v2702_v42 }
 0x505   : > { %v1111_v37 = vpop.permute.xlu0 %1110  ;;  %v1574_v51 = vsel %vm3313_vm1, %v1573_v11, %v1569_v22  ;;  %v1108_v54 = vpop.permute.xlu1 %1107  ;;  %v1431_v40 = vsel %vm3316_vm8, %v1430_v17, %v1426_v29  ;;  %vm3317_vm1 = vmmov %vm3314_vm13  ;;  %vm3318_vm13 = vcmask 1048512  }
 0x506   : > { %v1583_v62 = vrot.slane %v1111_v37, %v2558_v28  ;;  %v1578_v55 = vrot.slane %v1108_v54, %v2552_v0  ;;  %1206 = vperm.xlu0 %2211, %v795_v30   ;;  %1161 = vperm.xlu1 %2212, %v780_v33   ;;  %v1436_v41 = vsel %vm3318_vm13, %v1435_v23, %v1431_v40  ;;  %vm3319_vm9 = vmmov %vm3316_vm8  ;;  %vm3348_vm8 = vcmask 720512  }
 0x507   : > { %v1990_v35 = vsel %vm622_vm12, %v2841_v39, %v1436_v41  ;;  %v811_v33 = vsub.f32 %v2461_v14, %v2670_v2  ;;  %v796_v39 = vsub.f32 %v2469_v26, %v2658_v36  ;;  %v841_v54 = vsub.f32 %v2447_v6, %v2702_v42 }
 0x508   : > { %v1579_v8 = vsel %vm3315_vm14, %v1578_v55, %v1574_v51  ;;  %vm3320_vm14 = vmmov %vm3318_vm13  ;;  %vm3351_vm13 = vcmask 851712  }
 0x509   : > { %v1117_v38 = vpop.permute.xlu0 %1116  ;;  %v1584_v59 = vsel %vm3317_vm1, %v1583_v62, %v1579_v8  ;;  %v1114_v16 = vpop.permute.xlu1 %1113  ;;  %v826_v62 = vsub.f32 %v2455_v10, %v2686_v56  ;;  %vm3350_vm1 = vcmask 786112  }
 0x50a   : > { %v1593_v13 = vrot.slane %v1117_v38, %v2570_v48  ;;  %v1588_v43 = vrot.slane %v1114_v16, %v2564_v19  ;;  %1296 = vperm.xlu0 %2211, %v825_v12   ;;  %1251 = vperm.xlu1 %2212, %v810_v44   ;;  %v812_v38 = vsub.f32 %v2469_v26, %v2670_v2 }
 0x50c   : > { %v1589_v3 = vsel %vm3319_vm9, %v1588_v43, %v1584_v59  ;;  %v797_v59 = vsub.f32 %v2475_v34, %v2658_v36  ;;  %vm3343_vm9 = vcmask 589312  }
 0x50d   : > { %v1594_v11 = vsel %vm3320_vm14, %v1593_v13, %v1589_v3  ;;  %v1123_v47 = vpop.permute.xlu0 %1122  ;;  %v1120_v30 = vpop.permute.xlu1 %1119  ;;  %v842_v3 = vsub.f32 %v2455_v10, %v2702_v42  ;;  %vm3346_vm12 = vmmov %vm3343_vm9  ;;  %vm3352_vm14 = vcmask 917312  }
 0x50e   : > { %v1602_v63 = vrot.slane %v1123_v47, %v2487_v21  ;;  %v1598_v5 = vrot.slane %v1120_v30, %v2494_v15  ;;  %1164 = vperm.xlu0 %2211, %v781_v31   ;;  %1341 = vperm.xlu1 %2212, %v840_v27   ;;  %v2952_v22 = vsel %vm623_vm11, %v1594_v11, %v1990_v35 }
 0x50f   : > { %v827_v31 = vsub.f32 %v2461_v14, %v2686_v56  ;;  %v828_v30 = vsub.f32 %v2469_v26, %v2686_v56 }
 0x510   : > { %v1603_v18 = vsel %vm522_vm2, %v1602_v63, %v1598_v5  ;;  %v813_v63 = vsub.f32 %v2475_v34, %v2670_v2 }
 0x511   : > { %v1168_v4 = vpop.permute.xlu0 %1167  ;;  %v1126_v17 = vpop.permute.xlu1 %1125 }
 0x512   : > { %v1607_v37 = vrot.slane %v1126_v17, %v2490_v50  ;;  %1254 = vperm.xlu0 %2211, %v811_v33   ;;  %1209 = vperm.xlu1 %2212, %v796_v39   ;;  %v1677_v29 = vrot.slane %v1168_v4, %v2494_v15  ;;  %v3321_v33 = vld [vmem:[#allocation10_spill] sm:$0xff]  ;;  %v3322_v4 = vld [vmem:[#allocation8_spill] sm:$0xff]  ;;  %v3323_v17 = vld [vmem:[#allocation9_spill] sm:$0xff] }
 0x513   : > { %v2005_v39 = vpack.c.bf16 %v3321_v33, %v2371_v25  ;;  %v843_v25 = vsub.f32 %v2461_v14, %v2702_v42 }
 0x514   : > { %v1608_v51 = vsel %vm529_vm3, %v1607_v37, %v1603_v18  ;;  %v2004_v37 = vpack.c.bf16 %v3323_v17, %v3322_v4 }
 0x515   : > { %v1129_v55 = vpop.permute.xlu0 %1128  ;;  %v1171_v12 = vpop.permute.xlu1 %1170  ;;  %2020 = vmatprep.subr.bf16.mxu1 %v2005_v39 }
 0x516   : > { %v1612_v23 = vrot.slane %v1129_v55, %v2497_v52  ;;  %v1681_v8 = vrot.slane %v1171_v12, %v2487_v21  ;;  %1344 = vperm.xlu0 %2211, %v841_v54   ;;  %1299 = vperm.xlu1 %2212, %v826_v62  }
 0x517   : > { %2021 = vmatpush1.bf16.msra.mxu1 %v2004_v37 }
 0x518   : > { %v1613_v44 = vsel %vm536_vm4, %v1612_v23, %v1608_v51  ;;  %v1682_v40 = vsel %vm522_vm2, %v1681_v8, %v1677_v29  ;;  %v829_v29 = vsub.f32 %v2475_v34, %v2686_v56 }
 0x519   : > { %v1216_v16 = vpop.permute.xlu0 %1215  ;;  %v1174_v13 = vpop.permute.xlu1 %1173 }
 0x51a   : > { %v1686_v43 = vrot.slane %v1174_v13, %v2490_v50  ;;  %1257 = vperm.xlu0 %2211, %v812_v38   ;;  %1212 = vperm.xlu1 %2212, %v797_v59   ;;  %v1756_v11 = vrot.slane %v1216_v16, %v2494_v15  ;;  %v3326_v59 = vld [vmem:[#allocation11_spill] sm:$0xff]  ;;  %v3327_v16 = vld [vmem:[#allocation13_spill] sm:$0xff] }
 0x51b   : > { %v2006_v13 = vpack.c.bf16 %v3327_v16, %v3326_v59  ;;  %v3333_v59 = vld [vmem:[#allocation20_spill] sm:$0xff]  ;;  %v3334_v16 = vld [vmem:[#allocation21_spill] sm:$0xff] }
 0x51c   : > { %v1687_v41 = vsel %vm529_vm3, %v1686_v43, %v1682_v40  ;;  %v3325_v40 = vld [vmem:[#allocation14_spill] sm:$0xff] }
 0x51d   : > { %v1132_v27 = vpop.permute.xlu0 %1131  ;;  %v1219_v35 = vpop.permute.xlu1 %1218 }
 0x51e   : > { %v1617_v36 = vrot.slane %v1132_v27, %v2501_v58  ;;  %v1760_v47 = vrot.slane %v1219_v35, %v2487_v21  ;;  %1347 = vperm.xlu0 %2211, %v842_v3   ;;  %1302 = vperm.xlu1 %2212, %v827_v31   ;;  %v844_v31 = vsub.f32 %v2469_v26, %v2702_v42 }
 0x520   : > { %v1618_v5 = vsel %vm543_vm5, %v1617_v36, %v1613_v44  ;;  %v1761_v18 = vsel %vm522_vm2, %v1760_v47, %v1756_v11  ;;  %v3324_v44 = vld [vmem:[#allocation12_spill] sm:$0xff]  ;;  %v3329_v47 = vld [vmem:[#allocation15_spill] sm:$0xff] }
 0x521   : > { %v1222_v51 = vpop.permute.xlu0 %1221  ;;  %v1177_v54 = vpop.permute.xlu1 %1176  ;;  %v2007_v38 = vpack.c.bf16 %v3325_v40, %v3324_v44  ;;  %v3328_v11 = vld [vmem:[#allocation16_spill] sm:$0xff]  ;;  %v2013_v44 = vpack.c.bf16 %v2433_v61, %v2427_v57 }
 0x522   : > { %v1765_v62 = vrot.slane %v1222_v51, %v2490_v50  ;;  %v1691_v55 = vrot.slane %v1177_v54, %v2497_v52  ;;  %1305 = vperm.xlu0 %2211, %v828_v30   ;;  %1260 = vperm.xlu1 %2212, %v813_v63   ;;  %v2009_v36 = vpack.c.bf16 %v2405_v45, %v3328_v11  ;;  %v3330_v30 = vld [vmem:[#allocation17_spill] sm:$0xff] }
 0x523   : > { %2022 = vmatprep.subr.bf16.mxu1 %v2007_v38  ;;  %v2008_v63 = vpack.c.bf16 %v3330_v30, %v3329_v47  ;;  %v3337_v47 = vld [vmem:[#allocation24_spill] sm:$0xff]  ;;  %v3338_v30 = vld [vmem:[#allocation25_spill] sm:$0xff] }
 0x524   : > { %v1766_v2 = vsel %vm529_vm3, %v1765_v62, %v1761_v18  ;;  %v1692_v12 = vsel %vm536_vm4, %v1691_v55, %v1687_v41  ;;  %v845_v41 = vsub.f32 %v2475_v34, %v2702_v42  ;;  %2023 = vmatpush1.bf16.msra.mxu1 %v2006_v13 }
 0x525   : > { %v1267_v23 = vpop.permute.xlu0 %1266  ;;  %v1264_v8 = vpop.permute.xlu1 %1263  ;;  %2024 = vmatprep.subr.bf16.mxu1 %v2009_v36 }
 0x526   : > { %v1839_v43 = vrot.slane %v1267_v23, %v2487_v21  ;;  %v1835_v3 = vrot.slane %v1264_v8, %v2494_v15  ;;  %1308 = vperm.xlu0 %2211, %v829_v29   ;;  %1350 = vperm.xlu1 %2212, %v843_v25   ;;  %v3332_v23 = vld [vmem:[#allocation19_spill] sm:$0xff] }
 0x528   : > { %v1840_v56 = vsel %vm522_vm2, %v1839_v43, %v1835_v3  ;;  %2025 = vmatpush1.bf16.msra.mxu1 %v2008_v63  ;;  %v3335_v3 = vld [vmem:[#allocation22_spill] sm:$0xff]  ;;  %v2016_v63 = vpack.c.bf16 %v3338_v30, %v3337_v47 }
 0x529   : > { %v1180_v27 = vpop.permute.xlu0 %1179  ;;  %v1135_v35 = vpop.permute.xlu1 %1134 }
 0x52a   : > { %v1696_v18 = vrot.slane %v1180_v27, %v2501_v58  ;;  %v1622_v33 = vrot.slane %v1135_v35, %v2509_v9  ;;  %1356 = vperm.xlu0 %2211, %v845_v41   ;;  %1353 = vperm.xlu1 %2212, %v844_v31   ;;  %v2017_v35 = vpack.c.bf16 %v2461_v14, %v2455_v10 }
 0x52c   : > { %v1697_v39 = vsel %vm543_vm5, %v1696_v18, %v1692_v12  ;;  %v1623_v42 = vsel %vm550_vm6, %v1622_v33, %v1618_v5  ;;  %v2011_v5 = vpack.c.bf16 %v2419_v53, %v2413_v49  ;;  %v3331_v12 = vld [vmem:[#allocation18_spill] sm:$0xff]  ;;  %v2015_v49 = vpack.c.bf16 %v2447_v6, %v2441_v1 }
 0x52d   : > { %v1270_v4 = vpop.permute.xlu0 %1269  ;;  %v1225_v17 = vpop.permute.xlu1 %1224  ;;  %v2010_v8 = vpack.c.bf16 %v3332_v23, %v3331_v12 }
 0x52e   : > { %v1844_v37 = vrot.slane %v1270_v4, %v2490_v50  ;;  %v1770_v45 = vrot.slane %v1225_v17, %v2497_v52  ;;  %2026 = vmatprep.subr.bf16.mxu1 %v2011_v5  ;;  %v3340_v17 = vld [vmem:[#allocation26_spill] sm:$0xff] }
 0x52f   : > { %2027 = vmatpush1.bf16.msra.mxu1 %v2010_v8 }
 0x530   : > { %v1845_v51 = vsel %vm529_vm3, %v1844_v37, %v1840_v56  ;;  %v1771_v54 = vsel %vm536_vm4, %v1770_v45, %v1766_v2  ;;  %2028 = vmatprep.subr.bf16.mxu1 %v2013_v44  ;;  %v3336_v56 = vld [vmem:[#allocation23_spill] sm:$0xff] }
 0x531   : > { %v1315_v62 = vpop.permute.xlu0 %1314  ;;  %v1312_v55 = vpop.permute.xlu1 %1311  ;;  %v2014_v41 = vpack.c.bf16 %v3336_v56, %v3335_v3  ;;  %v3341_v37 = vld [vmem:[#allocation27_spill] sm:$0xff] }
 0x532   : > { %v1918_v29 = vrot.slane %v1315_v62, %v2487_v21  ;;  %v1914_v25 = vrot.slane %v1312_v55, %v2494_v15  ;;  %v2012_v21 = vpack.c.bf16 %v3334_v16, %v3333_v59  ;;  %v2018_v45 = vpack.c.bf16 %v3341_v37, %v3340_v17 }
 0x534   : > { %v1919_v40 = vsel %vm522_vm2, %v1918_v29, %v1914_v25  ;;  %2029 = vmatpush1.bf16.msra.mxu1 %v2012_v21  ;;  %vm3339_vm2 = vcmask 523712  }
 0x535   : > { %v1183_v38 = vpop.permute.xlu0 %1182  ;;  %v1138_v2 = vpop.permute.xlu1 %1137  ;;  %2030 = vmatprep.subr.bf16.mxu1 %v2015_v49  ;;  %vm3345_vm11 = vmmov %vm3339_vm2 }
 0x536   : > { %v1701_v15 = vrot.slane %v1183_v38, %v2509_v9  ;;  %v1627_v13 = vrot.slane %v1138_v2, %v2514_v24 }
 0x538   : > { %v1702_v53 = vsel %vm550_vm6, %v1701_v15, %v1697_v39  ;;  %v1628_v57 = vsel %vm557_vm7, %v1627_v13, %v1623_v42  ;;  %2031 = vmatpush1.bf16.msra.mxu1 %v2014_v41  ;;  %v2019_v39 = vpack.c.bf16 %v2475_v34, %v2469_v26 }
 0x539   : > { %v1273_v61 = vpop.permute.xlu0 %1272  ;;  %v1228_v43 = vpop.permute.xlu1 %1227  ;;  %2032 = vmatprep.subr.bf16.mxu1 %v2017_v35 }
 0x53a   : > { %v1849_v31 = vrot.slane %v1273_v61, %v2497_v52  ;;  %v1775_v27 = vrot.slane %v1228_v43, %v2501_v58 }
 0x53c   : > { %v1850_v1 = vsel %vm536_vm4, %v1849_v31, %v1845_v51  ;;  %v1776_v6 = vsel %vm543_vm5, %v1775_v27, %v1771_v54  ;;  %2033 = vmatpush1.bf16.msra.mxu1 %v2016_v63 }
 0x53d   : > { %v1141_v11 = vpop.permute.xlu0 %1140  ;;  %v1318_v36 = vpop.permute.xlu1 %1317  ;;  %2034 = vmatprep.subr.bf16.mxu1 %v2019_v39 }
 0x53e   : > { %v1632_v18 = vrot.slane %v1141_v11, %v2522_v20  ;;  %v1923_v33 = vrot.slane %v1318_v36, %v2490_v50 }
 0x540   : > { %v1633_v10 = vsel %vm3339_vm2, %v1632_v18, %v1628_v57  ;;  %v1924_v14 = vsel %vm529_vm3, %v1923_v33, %v1919_v40  ;;  %2035 = vmatpush1.bf16.msra.mxu1 %v2018_v45  ;;  %vm3342_vm3 = vmmov %vm3339_vm2  ;;  %vm3353_vm2 = vcmask 982912  }
 0x541   : > { %v1231_v42 = vpop.permute.xlu0 %1230  ;;  %v1186_v4 = vpop.permute.xlu1 %1185 }
 0x542   : > { %v1780_v51 = vrot.slane %v1231_v42, %v2509_v9  ;;  %v1706_v54 = vrot.slane %v1186_v4, %v2514_v24 }
 0x544   : > { %v1781_v50 = vsel %vm550_vm6, %v1780_v51, %v1776_v6  ;;  %v1707_v62 = vsel %vm557_vm7, %v1706_v54, %v1702_v53 }
 0x545   : > { %v1321_v26 = vpop.permute.xlu0 %1320  ;;  %v1276_v34 = vpop.permute.xlu1 %1275 }
 0x546   : > { %v1928_v55 = vrot.slane %v1321_v26, %v2497_v52  ;;  %v1854_v29 = vrot.slane %v1276_v34, %v2501_v58 }
 0x548   : > { %v1929_v25 = vsel %vm536_vm4, %v1928_v55, %v1924_v14  ;;  %v1855_v5 = vsel %vm543_vm5, %v1854_v29, %v1850_v1  ;;  %vm3344_vm4 = vcmask 654912  }
 0x549   : > { %v1189_v12 = vpop.permute.xlu0 %1188  ;;  %v1144_v23 = vpop.permute.xlu1 %1143 }
 0x54a   : > { %v1711_v8 = vrot.slane %v1189_v12, %v2522_v20  ;;  %v1637_v44 = vrot.slane %v1144_v23, %v2528_v60 }
 0x54c   : > { %v1712_v40 = vsel %vm3342_vm3, %v1711_v8, %v1707_v62  ;;  %v1638_v38 = vsel %vm3343_vm9, %v1637_v44, %v1633_v10  ;;  %vm3354_vm3 = vcmask 1048512  }
 0x54d   : > { %v1279_v2 = vpop.permute.xlu0 %1278  ;;  %v1234_v59 = vpop.permute.xlu1 %1233 }
 0x54e   : > { %v1859_v52 = vrot.slane %v1279_v2, %v2509_v9  ;;  %v1785_v16 = vrot.slane %v1234_v59, %v2514_v24 }
 0x550   : > { %v1860_v21 = vsel %vm550_vm6, %v1859_v52, %v1855_v5  ;;  %v1786_v15 = vsel %vm557_vm7, %v1785_v16, %v1781_v50 }
 0x551   : > { %v1147_v13 = vpop.permute.xlu0 %1146  ;;  %v1324_v49 = vpop.permute.xlu1 %1323 }
 0x552   : > { %v1642_v53 = vrot.slane %v1147_v13, %v2534_v7  ;;  %v1933_v57 = vrot.slane %v1324_v49, %v2501_v58 }
 0x554   : > { %v1643_v61 = vsel %vm3344_vm4, %v1642_v53, %v1638_v38  ;;  %v1934_v43 = vsel %vm543_vm5, %v1933_v57, %v1929_v25  ;;  %vm3347_vm5 = vmmov %vm3344_vm4 }
 0x555   : > { %v1237_v3 = vpop.permute.xlu0 %1236  ;;  %v1192_v56 = vpop.permute.xlu1 %1191  ;;  %vm3356_vm4 = vmmov %vm3350_vm1 }
 0x556   : > { %v1790_v41 = vrot.slane %v1237_v3, %v2522_v20  ;;  %v1716_v31 = vrot.slane %v1192_v56, %v2528_v60 }
 0x558   : > { %v1791_v27 = vsel %vm3345_vm11, %v1790_v41, %v1786_v15  ;;  %v1717_v35 = vsel %vm3346_vm12, %v1716_v31, %v1712_v40  ;;  %vm3358_vm11 = vmmov %vm3352_vm14 }
 0x559   : > { %v1327_v1 = vpop.permute.xlu0 %1326  ;;  %v1282_v6 = vpop.permute.xlu1 %1281  ;;  %vm3359_vm12 = vmmov %vm3353_vm2 }
 0x55a   : > { %v1938_v11 = vrot.slane %v1327_v1, %v2509_v9  ;;  %v1864_v58 = vrot.slane %v1282_v6, %v2514_v24 }
 0x55c   : > { %v3086_v36 = vsel %vm550_vm6, %v1938_v11, %v1934_v43  ;;  %v3089_v47 = vsel %vm557_vm7, %v1864_v58, %v1860_v21  ;;  %vm3349_vm6 = vmmov %vm3343_vm9 }
 0x55d   : > { %v1195_v30 = vpop.permute.xlu0 %1194  ;;  %v1150_v63 = vpop.permute.xlu1 %1149  ;;  %vm3355_vm9 = vmmov %vm3348_vm8 }
 0x55e   : > { %v1721_v18 = vrot.slane %v1195_v30, %v2534_v7  ;;  %v1647_v33 = vrot.slane %v1150_v63, %v2540_v32 }
 0x560   : > { %v1722_v39 = vsel %vm3347_vm5, %v1721_v18, %v1717_v35  ;;  %v1648_v10 = vsel %vm3348_vm8, %v1647_v33, %v1643_v61  ;;  %vm3360_vm5 = vmmov %vm3354_vm3  ;;  %vm3361_vm8 = vcmask 654912  }
 0x561   : > { %v3095_v14 = vpop.permute.xlu0 %1284  ;;  %v1240_v9 = vpop.permute.xlu1 %1239 }
 0x562   : > { %v1795_v42 = vrot.slane %v1240_v9, %v2528_v60 }
 0x564   : > { %v3099_v4 = vsel %vm3349_vm6, %v1795_v42, %v1791_v27  ;;  %vm3362_vm6 = vcmask 523712  }
 0x565   : > { %v1153_v17 = vpop.permute.xlu0 %1152  ;;  %v3101_v37 = vpop.permute.xlu1 %1329 }
 0x566   : > { %v1652_v38 = vrot.slane %v1153_v17, %v2546_v46 }
 0x568   : > { %v1653_v15 = vsel %vm3350_vm1, %v1652_v38, %v1648_v10  ;;  %vm3363_vm1 = vmmov %vm3355_vm9 }
 0x569   : > { %v1243_v45 = vpop.permute.xlu0 %1242  ;;  %v1198_v51 = vpop.permute.xlu1 %1197 }
 0x56a   : > { %v1726_v27 = vrot.slane %v1198_v51, %v2540_v32  ;;  %v1800_v9 = vrot.slane %v1243_v45, %v2534_v7  ;;  %v1869_v51 = vrot.slane %v3095_v14, %v2522_v20 }
 0x56c   : > { %v1727_v30 = vsel %vm3355_vm9, %v1726_v27, %v1722_v39  ;;  %vm3369_vm9 = vmmov %vm3363_vm1 }
 0x56d   : > { %v3103_v54 = vpop.permute.xlu0 %1332  ;;  %v3105_v50 = vpop.permute.xlu1 %1287 }
 0x571   : > { %v1201_v62 = vpop.permute.xlu0 %1200  ;;  %v1156_v26 = vpop.permute.xlu1 %1155 }
 0x572   : > { %v1657_v2 = vrot.slane %v1156_v26, %v2552_v0  ;;  %v1731_v35 = vrot.slane %v1201_v62, %v2546_v46  ;;  %v1874_v26 = vrot.slane %v3105_v50, %v2528_v60  ;;  %v1870_v50 = vsel %vm3362_vm6, %v1869_v51, %v3089_v47 }
 0x573   : > { %v1948_v47 = vrot.slane %v3103_v54, %v2522_v20 }
 0x574   : > { %v1658_v13 = vsel %vm3351_vm13, %v1657_v2, %v1653_v15  ;;  %v1732_v18 = vsel %vm3356_vm4, %v1731_v35, %v1727_v30 }
 0x575   : > { %v3107_v34 = vpop.permute.xlu0 %1290  ;;  %v1246_v55 = vpop.permute.xlu1 %1245 }
 0x576   : > { %v1805_v62 = vrot.slane %v1246_v55, %v2540_v32  ;;  %v1879_v45 = vrot.slane %v3107_v34, %v2534_v7  ;;  %v1801_v55 = vsel %vm3361_vm8, %v1800_v9, %v3099_v4 }
 0x579   : > { %v1159_v29 = vpop.permute.xlu0 %1158  ;;  %v3109_v25 = vpop.permute.xlu1 %1335 }
 0x57a   : > { %v1662_v16 = vrot.slane %v1159_v29, %v2558_v28 }
 0x57c   : > { %v1663_v57 = vsel %vm3352_vm14, %v1662_v16, %v1658_v13  ;;  %vm3366_vm14 = vmmov %vm3361_vm8 }
 0x57d   : > { %v1249_v5 = vpop.permute.xlu0 %1248  ;;  %v1204_v12 = vpop.permute.xlu1 %1203 }
 0x57e   : > { %v1736_v1 = vrot.slane %v1204_v12, %v2552_v0  ;;  %v1810_v29 = vrot.slane %v1249_v5, %v2546_v46  ;;  %v1806_v5 = vsel %vm3363_vm1, %v1805_v62, %v1801_v55 }
 0x581   : > { %v3111_v23 = vpop.permute.xlu0 %1338  ;;  %v3113_v8 = vpop.permute.xlu1 %1293 }
 0x582   : > { %v1884_v16 = vrot.slane %v3113_v8, %v2540_v32  ;;  %v1958_v20 = vrot.slane %v3111_v23, %v2534_v7 }
 0x585   : > { %v1207_v44 = vpop.permute.xlu0 %1206  ;;  %v1162_v40 = vpop.permute.xlu1 %1161 }
 0x586   : > { %v1667_v21 = vrot.slane %v1162_v40, %v2564_v19  ;;  %v1741_v58 = vrot.slane %v1207_v44, %v2558_v28 }
 0x588   : > { %v1668_v43 = vsel %vm3353_vm2, %v1667_v21, %v1663_v57 }
 0x589   : > { %v3117_v59 = vpop.permute.xlu0 %1296  ;;  %v1252_v52 = vpop.permute.xlu1 %1251 }
 0x58a   : > { %v1815_v44 = vrot.slane %v1252_v52, %v2552_v0  ;;  %v1943_v52 = vrot.slane %v3101_v37, %v2514_v24  ;;  %v1889_v4 = vrot.slane %v3117_v59, %v2546_v46  ;;  %v1953_v24 = vrot.slane %v3109_v25, %v2528_v60 }
 0x58d   : > { %v1165_v49 = vpop.permute.xlu0 %1164  ;;  %v3123_v53 = vpop.permute.xlu1 %1341 }
 0x58e   : > { %v1672_v61 = vrot.slane %v1165_v49, %v2570_v48  ;;  %v1963_v25 = vrot.slane %v3123_v53, %v2540_v32 }
 0x590   : > { %v1673_v3 = vsel %vm3354_vm3, %v1672_v61, %v1668_v43  ;;  %vm3368_vm3 = vmmov %vm3358_vm11 }
 0x591   : > { %v1992_v56 = vsel %vm625_vm15, %v1673_v3, %v2952_v22  ;;  %v1255_v41 = vpop.permute.xlu0 %1254  ;;  %v1210_v31 = vpop.permute.xlu1 %1209  ;;  %vm3357_vm15 = vmmov %vm3351_vm13 }
 0x592   : > { %v1746_v63 = vrot.slane %v1210_v31, %v2564_v19  ;;  %v1737_v22 = vsel %vm3357_vm15, %v1736_v1, %v1732_v18  ;;  %v1820_v2 = vrot.slane %v1255_v41, %v2558_v28  ;;  %vm3365_vm13 = vmmov %vm3356_vm4  ;;  %v1944_v41 = vsel %vm557_vm7, %v1943_v52, %v3086_v36 }
 0x593   : > { %v1742_v42 = vsel %vm3358_vm11, %v1741_v58, %v1737_v22  ;;  %v1811_v15 = vsel %vm3365_vm13, %v1810_v29, %v1806_v5  ;;  %vm3367_vm2 = vmmov %vm3357_vm15  ;;  %v3387_v29 = vld [vmem:[#allocation7_spill] sm:$0xff] }
 0x594   : > { %v1747_v39 = vsel %vm3359_vm12, %v1746_v63, %v1742_v42  ;;  %v1816_v49 = vsel %vm3367_vm2, %v1815_v44, %v1811_v15  ;;  %vm3370_vm4 = vmmov %vm3359_vm12 }
 0x595   : > { %v3134_v6 = vpop.permute.xlu0 %1344  ;;  %v1300_v11 = vpop.permute.xlu1 %1299  ;;  %v1821_v37 = vsel %vm3368_vm3, %v1820_v2, %v1816_v49  ;;  %vm3371_vm15 = vmmov %vm3365_vm13 }
 0x596   : > { %v1894_v8 = vrot.slane %v1300_v11, %v2552_v0  ;;  %vm3372_vm11 = vmmov %vm3360_vm5  ;;  %v1968_v7 = vrot.slane %v3134_v6, %v2546_v46 }
 0x597   : > { %vm3373_vm12 = vmmov %vm3362_vm6 }
 0x598   : > { %v1949_v27 = vsel %vm3373_vm12, %v1948_v47, %v1944_v41  ;;  %vm3376_vm7 = vmmov %vm3368_vm3 }
 0x599   : > { %v1258_v33 = vpop.permute.xlu0 %1257  ;;  %v1213_v10 = vpop.permute.xlu1 %1212  ;;  %vm3377_vm6 = vmmov %vm3366_vm14 }
 0x59a   : > { %v1751_v17 = vrot.slane %v1213_v10, %v2570_v48  ;;  %v1825_v34 = vrot.slane %v1258_v33, %v2564_v19  ;;  %vm3378_vm1 = vmmov %vm3370_vm4 }
 0x59b   : > { %vm3380_vm13 = vmmov %vm3372_vm11 }
 0x59c   : > { %v1752_v12 = vsel %vm3360_vm5, %v1751_v17, %v1747_v39  ;;  %v1826_v3 = vsel %vm3370_vm4, %v1825_v34, %v1821_v37  ;;  %vm3374_vm5 = vmmov %vm3367_vm2  ;;  %v2261_v34 = vmov (!%p2164_p7), 1  }
 0x59d   : > { %v1993_v40 = vsel %vm627_vm10, %v1752_v12, %v1992_v56  ;;  %v1348_v38 = vpop.permute.xlu0 %1347  ;;  %v1303_v14 = vpop.permute.xlu1 %1302  ;;  %vm3364_vm10 = vcmask 589312   ;;  %vm3384_vm4 = vmmov %vm3372_vm11  ;;  %2215 = vset.pattern.permute.xlu0 (!%p2164_p7), %v2261_v34 }
 0x59e   : > { %v1875_v21 = vsel %vm3364_vm10, %v1874_v26, %v1870_v50  ;;  %v1899_v43 = vrot.slane %v1303_v14, %v2558_v28  ;;  %vm3375_vm8 = vmmov %vm3364_vm10  ;;  %v1973_v58 = vrot.slane %v1348_v38, %v2552_v0  ;;  %v3386_v26 = vld [vmem:[#allocation28_spill] sm:$0xff]  ;;  %v2002_v38 = vld [vmem:[#allocation3 + $0x8] sm:$0xff] }
 0x59f   : > { %v1880_v13 = vsel %vm3366_vm14, %v1879_v45, %v1875_v21  ;;  %v1954_v36 = vsel %vm3375_vm8, %v1953_v24, %v1949_v27  ;;  %vm3379_vm10 = vmmov %vm3369_vm9  ;;  %vm3382_vm14 = vcmask 1046534  }
 0x5a0   : > { %v1885_v54 = vsel %vm3369_vm9, %v1884_v16, %v1880_v13  ;;  %v1959_v53 = vsel %vm3377_vm6, %v1958_v20, %v1954_v36  ;;  %vm3383_vm9 = vmmov %vm3378_vm1 }
 0x5a1   : > { %v1306_v57 = vpop.permute.xlu0 %1305  ;;  %v1261_v61 = vpop.permute.xlu1 %1260  ;;  %v1890_v60 = vsel %vm3371_vm15, %v1889_v4, %v1885_v54  ;;  %v1964_v6 = vsel %vm3379_vm10, %v1963_v25, %v1959_v53 }
 0x5a2   : > { %v1830_v59 = vrot.slane %v1261_v61, %v2570_v48  ;;  %v1904_v56 = vrot.slane %v1306_v57, %v2564_v19  ;;  %v1895_v23 = vsel %vm3374_vm5, %v1894_v8, %v1890_v60 }
 0x5a3   : > { %v1900_v30 = vsel %vm3376_vm7, %v1899_v43, %v1895_v23 }
 0x5a4   : > { %v1831_v31 = vsel %vm3372_vm11, %v1830_v59, %v1826_v3  ;;  %v1905_v63 = vsel %vm3378_vm1, %v1904_v56, %v1900_v30  ;;  %vm3388_vm11 = vcmp.eq.s32.totalorder %v3386_v26, %v3387_v29 }
 0x5a5   : > { %v1994_v35 = vsel %vm629_vm0, %v1831_v31, %v1993_v40  ;;  %v1309_v1 = vpop.permute.xlu0 %1308  ;;  %v1351_v11 = vpop.permute.xlu1 %1350  ;;  %vm3381_vm0 = vmmov %vm3371_vm15  ;;  %vm3385_vm15 = vcmask 1047559  }
 0x5a6   : > { %v1909_v32 = vrot.slane %v1309_v1, %v2570_v48  ;;  %v1978_v46 = vrot.slane %v1351_v11, %v2558_v28  ;;  %v1969_v22 = vsel %vm3381_vm0, %v1968_v7, %v1964_v6 }
 0x5a7   : > { %v1974_v9 = vsel %vm3367_vm2, %v1973_v58, %v1969_v22 }
 0x5a8   : > { %v1910_v18 = vsel %vm3380_vm13, %v1909_v32, %v1905_v63  ;;  %v1979_v51 = vsel %vm3368_vm3, %v1978_v46, %v1974_v9 }
 0x5a9   : > { %v1995_v33 = vsel %vm3382_vm14, %v1910_v18, %v1994_v35  ;;  %v1357_v10 = vpop.permute.xlu0 %1356  ;;  %v1354_v0 = vpop.permute.xlu1 %1353 }
 0x5aa   : > { %v1988_v42 = vrot.slane %v1357_v10, %v2570_v48  ;;  %v1983_v17 = vrot.slane %v1354_v0, %v2564_v19  ;;  %v2001_v48 = vld [vmem:[#allocation3] sm:$0xff] }
 0x5ac   : > { %v1984_v28 = vsel %vm3383_vm9, %v1983_v17, %v1979_v51 }
 0x5ad   : > { %v1989_v62 = vsel %vm3384_vm4, %v1988_v42, %v1984_v28 }
 0x5ae   : > { %v1996_v39 = vsel %vm3385_vm15, %v1989_v62, %v1995_v33 }
 0x5af   : > { %v1998_v12 = vsel %vm3388_vm11, %v1996_v39, -1e+30 }
 0x5b0   : > { %v1999_v45 = vmul.f32 1.442695, %v1998_v12 }
 0x5b2   : > { %2213 = vpow2.f32 %v1999_v45 }
 0x5bc   : > { %v2214_v44 = vpop.eup %2213 }
 0x5bd   : > { %v2003_v40 = vpack.c.bf16 %v2214_v44, %v2214_v44 }
 0x5bf   : > { %2053 = vmatmul.mubr.bf16.vlgmr.msra.gmra.mrb[0].mxu1 %v2003_v40 }
 0x690   : > { %2068 = sbr.rel (%p2164_p7) target bundleno = 1838 (0x72e), region = 48 }
 0x692   : > { %v2054_v19 = vpop.f32.mrb[0].mxu1 }
 0x693   : > { %v2061_v14 = vadd.f32 %v2054_v19, %v2001_v48  ;;  %v2056_v55 = vpop.f32.mrb[1].mxu1 }
 0x694   : > { %v2062_v2 = vadd.f32 %v2056_v55, %v2002_v38  ;;  %v2058_v50 = vpop.f32.mrb[2].mxu1 }
 0x695   : > { %2063 = vst [vmem:[#allocation3] sm:$0xff] %v2061_v14  ;;  %v2059_v5 = vpop.f32.mrb[3].mxu1 }
 0x696   : > { %2064 = vst [vmem:[#allocation3 + $0x8] sm:$0xff] %v2062_v2 }
 0x69c   : > { %v2070_v15 = vld [vmem:[#allocation3] sm:$0xff] }
 0x69d   : > { %v2069_v16 = vld [vmem:[#allocation3 + $0x8] sm:$0xff] }
 0x69e   : > { %v2071_v52 = vadd.f32 1e-16, %v2069_v16 }
 0x6a0   : > { %2074 = vperm.xlu0 %2215, %v2071_v52  }
 0x71f   : > { %v2075_v21 = vpop.permute.xlu0 %2074 }
 0x720   : > { %2216 = vrcp.f32 %v2075_v21 }
 0x72a   : > { %v2217_v4 = vpop.eup %2216 }
 0x72b   : > { %v2078_v47 = vmul.f32 %v2217_v4, %v2070_v15 }
 0x72d   : > { %2079 = vst [vmem:[#allocation4] sm:$0xff] %v2078_v47 }
 0x72e PF: > { %p2175_p8 = scmp.eq.s32.totalorder %s2294_s16, 1  ;;  %s2262_s13 = smov [#allocation4]  }
 0x72f   : > { %s2087_s14 = sshll.u32 %s2262_s13, 4  ;;  %s2088_s14 = int_to_ptr.vmem [resolvable:$true] %s2087_s14 }
 0x730   : > { %s2218_s17 = scalar_lea.vmem %s2088_s14, 128  ;;  %p2225_p12 = scmp.lt.s32.totalorder %s2088_s14, %s2088_s14 }
 0x731   : > { %p2219_p9 = scmp.ne.s32.totalorder %s2088_s14, %s2218_s17  ;;  %p2226_p13 = scmp.lt.s32.totalorder %s2218_s17, %s2218_s17 }
 0x733   : > { %p2220_p10 = pnand %p2219_p9, %p2175_p8  ;;  %p2227_p0 = por %p2226_p13, %p2225_p12 }
 0x735   : > { %p2221_p11 = pneg %p2220_p10 }
 0x737   : > { %p2228_p1 = pnand %p2227_p0, %p2221_p11 }
 0x739   : > { %2231 = shalt.err (!%p2228_p1)
}
 0x73a   : > { %s2232_s20 = scalar_lea.hbm %s3249_s4, 128 }
 0x73b   : > { %p2233_p2 = scmp.ne.s32.totalorder %s3249_s4, %s2232_s20  ;;  %p2238_p5 = scmp.lt.u32.totalorder %s2232_s20, %s3249_s4 }
 0x73d   : > { %p2234_p3 = pnand %p2233_p2, %p2175_p8 }
 0x73f   : > { %p2235_p4 = pneg %p2234_p3 }
 0x741   : > { %p2240_p6 = pnand %p2238_p5, %p2235_p4 }
 0x743   : > { %2243 = shalt.err (!%p2240_p6)
}
 0x744   : > { %2172 = dma.vmem_to_hbm [thread:$0]  (%p2175_p8), %s2088_s14, 128, %s3249_s4, [#allocation5]  }
 0x745   : > { %2249 = dma.done.wait (%p2175_p8), [#allocation5], 128  }
 0x746   : > { %2251 = vsyncadd (%p2175_p8), [#allocation5], 4294967168 }
 0x747 PF: > { %s15_s15 = sadd.s32 1, %s2254_s15  }
 0x748   : > { %p12_p7 = scmp.ge.s32.totalorder %s15_s15, 4  }
 0x74a   :  { %14 = sbr.rel (!%p12_p7) target bundleno = 1 (0x1), region = 78 }
 0x751   :  { %2100 = vsyncpa [#allocation5], 1 }
 0x752   :  { %2102 = vsyncpa [#allocation5 + $0x1], 1 }

</bundles_post_ra>
